<compile_context>
chip_gen: v7x
topology: tpu7x:2x2x1
jax: 0.10.0
libtpu: 0.0.40
codegen_flags: <defaults>
</compile_context>

<pallas_src>
import functools

import jax
import jax.numpy as jnp
from jax import lax
from jax.experimental import pallas as pl
from jax.experimental.pallas import tpu as pltpu

LANES = 128


def _dwconv_kernel(x_ref, x_hbm, w_ref, b_ref, o_ref, xpad_ref, acc_ref, sem, *, K):
    # Per grid step:
    #   x_ref   : (1, TH, W, Cg)       body rows (auto double-buffered pipeline)
    #   x_hbm   : (NB, H, W, Cg)       full input, left in HBM (halo-row DMAs)
    #   w_ref   : (1, K*K, Cg)         depthwise taps for this channel group
    #   b_ref   : (1, 1, Cg)           bias for this channel group
    #   o_ref   : (1, TH, W, Cg)
    #   xpad_ref: (TH + 2*pad, W, Cg)  body + halo assembly buffer (input dtype)
    #   acc_ref : (TH, W, Cg) f32      accumulator
    #   sem     : DMA semaphores (2,)  top / bottom halo copies
    b = pl.program_id(0)
    ht = pl.program_id(1)
    num_ht = pl.num_programs(1)

    TH, W, Cg = acc_ref.shape
    H_total = x_hbm.shape[1]
    pad = K // 2

    h0 = ht * TH
    has_top = ht > 0
    has_bot = ht < num_ht - 1

    # Halo-row DMA descriptors (row starts clamped; the copies only start when the
    # neighbouring rows actually exist).
    row_top = jnp.maximum(h0 - pad, 0)
    row_bot = jnp.minimum(h0 + TH, max(H_total - pad, 0))
    top_cp = pltpu.make_async_copy(
        x_hbm.at[b, pl.ds(row_top, pad)], xpad_ref.at[0:pad], sem.at[0])
    bot_cp = pltpu.make_async_copy(
        x_hbm.at[b, pl.ds(row_bot, pad)], xpad_ref.at[TH + pad:TH + 2 * pad], sem.at[1])

    @pl.when(has_top)
    def _():
        top_cp.start()

    @pl.when(has_bot)
    def _():
        bot_cp.start()

    # Assemble the body rows while the halo DMAs are in flight.  H is not a layout
    # axis, so this is a plain streaming VMEM copy (no relayout).
    xpad_ref[pad:pad + TH] = x_ref[0]

    # Zero 'same' padding at the image boundary.
    zero_rows = jnp.zeros((pad, W, Cg), xpad_ref.dtype)

    @pl.when(jnp.logical_not(has_top))
    def _():
        xpad_ref[0:pad] = zero_rows

    @pl.when(jnp.logical_not(has_bot))
    def _():
        xpad_ref[TH + pad:TH + 2 * pad] = zero_rows

    @pl.when(has_top)
    def _():
        top_cp.wait()

    @pl.when(has_bot)
    def _():
        bot_cp.wait()

    # f32 accumulation in VMEM scratch; bias is added in the final store.
    acc_ref[...] = jnp.zeros_like(acc_ref)

    w_all = w_ref[...].astype(jnp.float32)                          # (1, K*K, Cg), loaded once
    col = lax.broadcasted_iota(jnp.int32, (TH + 2 * pad, W, Cg), 1)  # W (sublane) index

    # kw outermost: one sublane shift (XLU roll + mask) per kw; the kh taps below
    # only differ by an H offset (free addressing into the shifted view).
    for kw in range(K):
        shift = pad - kw                       # view[w] = x[w + kw - pad] = x[w - shift]
        xs = xpad_ref[...]
        if shift != 0:
            xs = pltpu.roll(xs, shift % W, 1)
            if shift > 0:
                xs = jnp.where(col >= shift, xs, 0)        # zero wrapped left columns
            else:
                xs = jnp.where(col < W + shift, xs, 0)     # zero wrapped right columns
        xs = xs.astype(jnp.float32)

        tap = w_all[:, kw:kw + 1, :]                       # (1, 1, Cg), kh = 0
        contrib = xs[0:TH] * tap
        for kh in range(1, K):
            tap = w_all[:, kh * K + kw:kh * K + kw + 1, :]
            contrib = contrib + xs[kh:kh + TH] * tap
        acc_ref[...] += contrib

    bias = b_ref[...].astype(jnp.float32)                  # (1, 1, Cg)
    o_ref[0] = (acc_ref[...] + bias).astype(o_ref.dtype)


def _choose_tile_h(H, W, Cg, itemsize, pad):
    # Budget ~1.5 MiB per (tile_h, W, Cg) slab: with double-buffered in/out blocks,
    # the halo'd assembly scratch, the f32 accumulator and the per-kw shifted
    # temporaries (~10 slabs total) this stays well under the 32 MiB scoped VMEM
    # limit on every TPU generation (v7x has only 64 MiB physical VMEM per TC).
    slab_bytes = max(1, W * Cg * max(itemsize, 4))
    max_th = max(pad, (1536 * 1024) // slab_bytes)
    if H > 8:
        # Keep at least 2 H tiles so the grid shards across v7x's two TensorCores
        # (and pipelines) even for batch size 1.
        max_th = min(max_th, max(8, H // 2))
    th = H  # fall back to a single tile if no divisor fits the budget
    for cand in range(1, H + 1):
        if H % cand == 0 and pad <= cand <= max_th:
            th = cand
    return th


def _dwconv_core(x_g, w_g, b_g, *, kernel_size, tile_h=None):
    """Channels-last grouped depthwise conv.

    x_g: (NB, H, W, Cg) with Cg a multiple of 128 and NB = N * num_channel_groups.
    w_g: (num_cg, K*K, Cg);  b_g: (num_cg, 1, Cg).
    A channels-last model can call this directly and skip all layout passes.
    """
    NB, H, W, Cg = x_g.shape
    num_cg, KK, _ = w_g.shape
    K = kernel_size
    pad = K // 2
    assert K % 2 == 1, "only odd kernel sizes give symmetric 'same' padding"
    assert KK == K * K and w_g.shape[2] == Cg and b_g.shape == (num_cg, 1, Cg)
    assert Cg % LANES == 0 and NB % num_cg == 0
    assert W >= K and H >= 1

    if tile_h is None:
        tile_h = _choose_tile_h(H, W, Cg, x_g.dtype.itemsize, pad)
    assert H % tile_h == 0 and (tile_h >= pad or tile_h == H)
    num_ht = H // tile_h

    kernel = functools.partial(_dwconv_kernel, K=K)

    return pl.pallas_call(
        kernel,
        out_shape=jax.ShapeDtypeStruct((NB, H, W, Cg), x_g.dtype),
        grid_spec=pltpu.PrefetchScalarGridSpec(
            num_scalar_prefetch=0,
            grid=(NB, num_ht),
            in_specs=[
                # Body rows of the current H tile: auto double-buffered pipeline.
                pl.BlockSpec((1, tile_h, W, Cg), lambda b, ht: (b, ht, 0, 0)),
                # Same array, left in HBM, for the two small halo-row DMAs.
                pl.BlockSpec(memory_space=pl.ANY),
                # Per-channel-group taps / bias (VMEM resident across grid steps).
                pl.BlockSpec((1, K * K, Cg), lambda b, ht: (b % num_cg, 0, 0)),
                pl.BlockSpec((1, 1, Cg), lambda b, ht: (b % num_cg, 0, 0)),
            ],
            out_specs=pl.BlockSpec((1, tile_h, W, Cg), lambda b, ht: (b, ht, 0, 0)),
            scratch_shapes=[
                pltpu.VMEM((tile_h + 2 * pad, W, Cg), x_g.dtype),   # halo assembly
                pltpu.VMEM((tile_h, W, Cg), jnp.float32),           # f32 accumulator
                pltpu.SemaphoreType.DMA((2,)),                      # top / bottom halo
            ],
        ),
        compiler_params=pltpu.CompilerParams(
            # Both axes are independent -> shards across v7x's two TensorCores even
            # when N == 1 (the H-tile axis supplies the parallelism).
            dimension_semantics=("parallel", "parallel"),
            # Explicit scoped-VMEM limit, safe on every generation (v5e default is
            # only 16 MiB); tiles are budgeted to sit well below this.
            vmem_limit_bytes=32 * 1024 * 1024,
        ),
    )(x_g, x_g, w_g, b_g)


def dwconv_pallas(x_nchw, weight, bias, kernel_size=3, tile_h=None):
    """DWConv forward (stride 1, 'same' zero padding, bias), PyTorch NCHW layout.

    x_nchw: (N, C, H, W); weight: (C, K, K) (PyTorch (C,1,K,K) squeezed); bias: (C,).

    The only wrapper-side HBM pass is the single NCHW <-> channels-last-group
    relayout needed to honour the PyTorch layout (channels-last callers should use
    `_dwconv_core` directly and skip it).  Spatial padding happens inside the
    kernel, and the channel round-up to a multiple of 128 lanes is a no-op for the
    real DPFlow width (dim = 768).
    """
    N, C, H, W = x_nchw.shape
    K = kernel_size
    assert K % 2 == 1
    assert weight.shape == (C, K, K) and bias.shape == (C,)

    Cp = ((C + LANES - 1) // LANES) * LANES
    num_cg = Cp // LANES
    if Cp != C:
        x_p = jnp.pad(x_nchw, ((0, 0), (0, Cp - C), (0, 0), (0, 0)))
        w_p = jnp.pad(weight, ((0, Cp - C), (0, 0), (0, 0)))
        b_p = jnp.pad(bias, (0, Cp - C))
    else:
        x_p, w_p, b_p = x_nchw, weight, bias

    # Single relayout pass (XLA fuses the pad into it): NCHW -> (N*G, H, W, 128).
    x_g = (x_p.reshape(N, num_cg, LANES, H, W)
              .transpose(0, 1, 3, 4, 2)
              .reshape(N * num_cg, H, W, LANES))
    w_g = (w_p.reshape(num_cg, LANES, K, K)
              .transpose(0, 2, 3, 1)
              .reshape(num_cg, K * K, LANES))
    b_g = b_p.reshape(num_cg, 1, LANES)

    out_g = _dwconv_core(x_g, w_g, b_g, kernel_size=K, tile_h=tile_h)

    out = (out_g.reshape(N, num_cg, H, W, LANES)
                .transpose(0, 1, 4, 2, 3)
                .reshape(N, Cp, H, W))
    return out[:, :C] if Cp != C else out


def _reference_dwconv(x_nchw, weight, bias, kernel_size=3):
    # Pure-JAX reference (lax grouped conv) for the correctness check.
    C = x_nchw.shape[1]
    w = weight.reshape(C, 1, kernel_size, kernel_size)  # OIHW, I = 1 (grouped)
    out = lax.conv_general_dilated(
        x_nchw, w,
        window_strides=(1, 1),
        padding="SAME",
        dimension_numbers=("NCHW", "OIHW", "NCHW"),
        feature_group_count=C,
    )
    return out + bias.reshape(1, C, 1, 1)


if __name__ == "__main__":
    def run_case(N, C, H, W, K, key):
        kx, kwt, kb = jax.random.split(key, 3)
        x = jax.random.normal(kx, (N, C, H, W), dtype=jnp.float32)
        fan_in = K * K
        bound = 1.0 / (fan_in ** 0.5)
        weight = jax.random.uniform(kwt, (C, K, K), jnp.float32, -bound, bound)
        bias = jax.random.uniform(kb, (C,), jnp.float32, -bound, bound)

        out = jax.block_until_ready(dwconv_pallas(x, weight, bias, kernel_size=K))
        ref = _reference_dwconv(x, weight, bias, kernel_size=K)
        assert out.shape == (N, C, H, W)
        assert jnp.allclose(out, ref, atol=1e-5, rtol=1e-5), (
            f"mismatch: max err {jnp.max(jnp.abs(out - ref))}")

    # C=32 exercises the channel round-up (32 -> 128 lanes); H=16 -> tile_h=8
    # exercises the halo-row DMA path on both interior and boundary tiles.
    run_case(2, 32, 16, 16, 3, jax.random.PRNGKey(0))
    # C=256 exercises multiple 128-lane channel groups (no padding) with batch 1,
    # where the parallel H-tile grid axis supplies the core-level parallelism.
    run_case(1, 256, 16, 8, 3, jax.random.PRNGKey(1))

    print("KERNEL_OK")
</pallas_src>

<mosaic_0001>
module attributes {stable_mosaic.version = 11 : i64} {
  func.func @_dwconv_kernel(%arg0: i32, %arg1: i32, %arg2: memref<1x8x16x128xf32, #tpu.memory_space<vmem>>, %arg3: memref<2x16x16x128xf32, #tpu.memory_space<any>>, %arg4: memref<1x9x128xf32, #tpu.memory_space<vmem>>, %arg5: memref<1x1x128xf32, #tpu.memory_space<vmem>>, %arg6: memref<1x8x16x128xf32, #tpu.memory_space<vmem>>, %arg7: memref<10x16x128xf32, #tpu.memory_space<vmem>>, %arg8: memref<8x16x128xf32, #tpu.memory_space<vmem>>, %arg9: memref<2x!tpu.dma_semaphore, #tpu.memory_space<semaphore_mem>>) attributes {dimension_semantics = [#tpu.dimension_semantics<parallel>, #tpu.dimension_semantics<parallel>], iteration_bounds = array<i64: 2, 2>, scalar_prefetch = 0 : i64, scratch_operands = 3 : i64, tpu.core_type = #tpu.core_type<tc>, window_params = [{transform_indices = @transform_0, window_bounds = array<i64: 1, 8, 16, 128>}, {}, {transform_indices = @transform_2, window_bounds = array<i64: 1, 9, 128>}, {transform_indices = @transform_3, window_bounds = array<i64: 1, 1, 128>}, {transform_indices = @transform_4, window_bounds = array<i64: 1, 8, 16, 128>}]} {
    %c8_i32 = arith.constant 8 : i32
    %0 = arith.muli %arg1, %c8_i32 : i32
    %c0_i32 = arith.constant 0 : i32
    %1 = arith.cmpi sgt, %arg1, %c0_i32 : i32
    %c1_i32 = arith.constant 1 : i32
    %2 = arith.cmpi slt, %arg1, %c1_i32 : i32
    %c1_i32_0 = arith.constant 1 : i32
    %3 = arith.subi %0, %c1_i32_0 : i32
    %c0_i32_1 = arith.constant 0 : i32
    %4 = arith.maxsi %3, %c0_i32_1 : i32
    %c8_i32_2 = arith.constant 8 : i32
    %5 = arith.addi %0, %c8_i32_2 : i32
    %c15_i32 = arith.constant 15 : i32
    %6 = arith.minsi %5, %c15_i32 : i32
    %7 = arith.extui %1 : i1 to i32
    %c0_i32_3 = arith.constant 0 : i32
    %c0_i32_4 = arith.constant 0 : i32
    %8 = arith.cmpi ne, %7, %c0_i32_4 : i32
    scf.if %8 {
      %c0_i32_69 = arith.constant 0 : i32
      %c0_i32_70 = arith.constant 0 : i32
      %102 = tpu.memref_slice %arg3[%arg0, %4, %c0_i32_69, %c0_i32_70] : memref<2x16x16x128xf32, #tpu.memory_space<any>> -> memref<1x1x16x128xf32, #tpu.memory_space<any>>
      %103 = tpu.memref_squeeze %102 : memref<1x1x16x128xf32, #tpu.memory_space<any>> -> memref<1x16x128xf32, #tpu.memory_space<any>>
      %c0_i32_71 = arith.constant 0 : i32
      %c0_i32_72 = arith.constant 0 : i32
      %c0_i32_73 = arith.constant 0 : i32
      %104 = tpu.memref_slice %arg7[%c0_i32_71, %c0_i32_72, %c0_i32_73] : memref<10x16x128xf32, #tpu.memory_space<vmem>> -> memref<1x16x128xf32, #tpu.memory_space<vmem>>
      %105 = tpu.memref_slice %arg9[%c0_i32_3] : memref<2x!tpu.dma_semaphore, #tpu.memory_space<semaphore_mem>> -> memref<1x!tpu.dma_semaphore, #tpu.memory_space<semaphore_mem>>
      %106 = tpu.memref_squeeze %105 : memref<1x!tpu.dma_semaphore, #tpu.memory_space<semaphore_mem>> -> memref<!tpu.dma_semaphore, #tpu.memory_space<semaphore_mem>>
      tpu.enqueue_dma source(%103 : memref<1x16x128xf32, #tpu.memory_space<any>>) target(%104 : memref<1x16x128xf32, #tpu.memory_space<vmem>>) target_semaphore(%106 : memref<!tpu.dma_semaphore, #tpu.memory_space<semaphore_mem>>)
    } else {
    }
    %9 = arith.extui %2 : i1 to i32
    %c1_i32_5 = arith.constant 1 : i32
    %c0_i32_6 = arith.constant 0 : i32
    %10 = arith.cmpi ne, %9, %c0_i32_6 : i32
    scf.if %10 {
      %c0_i32_69 = arith.constant 0 : i32
      %c0_i32_70 = arith.constant 0 : i32
      %102 = tpu.memref_slice %arg3[%arg0, %6, %c0_i32_69, %c0_i32_70] : memref<2x16x16x128xf32, #tpu.memory_space<any>> -> memref<1x1x16x128xf32, #tpu.memory_space<any>>
      %103 = tpu.memref_squeeze %102 : memref<1x1x16x128xf32, #tpu.memory_space<any>> -> memref<1x16x128xf32, #tpu.memory_space<any>>
      %c9_i32 = arith.constant 9 : i32
      %c0_i32_71 = arith.constant 0 : i32
      %c0_i32_72 = arith.constant 0 : i32
      %104 = tpu.memref_slice %arg7[%c9_i32, %c0_i32_71, %c0_i32_72] : memref<10x16x128xf32, #tpu.memory_space<vmem>> -> memref<1x16x128xf32, #tpu.memory_space<vmem>>
      %105 = tpu.memref_slice %arg9[%c1_i32_5] : memref<2x!tpu.dma_semaphore, #tpu.memory_space<semaphore_mem>> -> memref<1x!tpu.dma_semaphore, #tpu.memory_space<semaphore_mem>>
      %106 = tpu.memref_squeeze %105 : memref<1x!tpu.dma_semaphore, #tpu.memory_space<semaphore_mem>> -> memref<!tpu.dma_semaphore, #tpu.memory_space<semaphore_mem>>
      tpu.enqueue_dma source(%103 : memref<1x16x128xf32, #tpu.memory_space<any>>) target(%104 : memref<1x16x128xf32, #tpu.memory_space<vmem>>) target_semaphore(%106 : memref<!tpu.dma_semaphore, #tpu.memory_space<semaphore_mem>>)
    } else {
    }
    %c0 = arith.constant 0 : index
    %c0_7 = arith.constant 0 : index
    %c0_8 = arith.constant 0 : index
    %c0_9 = arith.constant 0 : index
    %11 = vector.load %arg2[%c0, %c0_7, %c0_8, %c0_9] : memref<1x8x16x128xf32, #tpu.memory_space<vmem>>, vector<1x8x16x128xf32>
    %12 = vector.shape_cast %11 : vector<1x8x16x128xf32> to vector<8x16x128xf32>
    %c1 = arith.constant 1 : index
    %c0_10 = arith.constant 0 : index
    %c0_11 = arith.constant 0 : index
    %13 = vector.load %arg7[%c1, %c0_10, %c0_11] : memref<10x16x128xf32, #tpu.memory_space<vmem>>, vector<8x16x128xf32>
    tpu.vector_store %arg7[%c1, %c0_10, %c0_11], %12 {strides = array<i32>} : memref<10x16x128xf32, #tpu.memory_space<vmem>>, vector<8x16x128xf32>,
    %cst = arith.constant 0.000000e+00 : f32
    %14 = vector.broadcast %cst : f32 to vector<1x16x128xf32>
    %true = arith.constant true
    %15 = arith.xori %1, %true : i1
    %16 = arith.extui %15 : i1 to i32
    %c0_i32_12 = arith.constant 0 : i32
    %17 = arith.cmpi ne, %16, %c0_i32_12 : i32
    scf.if %17 {
      %c0_69 = arith.constant 0 : index
      %c0_70 = arith.constant 0 : index
      %c0_71 = arith.constant 0 : index
      %102 = vector.load %arg7[%c0_69, %c0_70, %c0_71] : memref<10x16x128xf32, #tpu.memory_space<vmem>>, vector<1x16x128xf32>
      tpu.vector_store %arg7[%c0_69, %c0_70, %c0_71], %14 {strides = array<i32>} : memref<10x16x128xf32, #tpu.memory_space<vmem>>, vector<1x16x128xf32>,
    } else {
    }
    %true_13 = arith.constant true
    %18 = arith.xori %2, %true_13 : i1
    %19 = arith.extui %18 : i1 to i32
    %c0_i32_14 = arith.constant 0 : i32
    %20 = arith.cmpi ne, %19, %c0_i32_14 : i32
    scf.if %20 {
      %c9 = arith.constant 9 : index
      %c0_69 = arith.constant 0 : index
      %c0_70 = arith.constant 0 : index
      %102 = vector.load %arg7[%c9, %c0_69, %c0_70] : memref<10x16x128xf32, #tpu.memory_space<vmem>>, vector<1x16x128xf32>
      tpu.vector_store %arg7[%c9, %c0_69, %c0_70], %14 {strides = array<i32>} : memref<10x16x128xf32, #tpu.memory_space<vmem>>, vector<1x16x128xf32>,
    } else {
    }
    %21 = arith.extui %1 : i1 to i32
    %c0_i32_15 = arith.constant 0 : i32
    %c0_i32_16 = arith.constant 0 : i32
    %22 = arith.cmpi ne, %21, %c0_i32_16 : i32
    scf.if %22 {
      %c0_i32_69 = arith.constant 0 : i32
      %c0_i32_70 = arith.constant 0 : i32
      %102 = tpu.memref_slice %arg3[%arg0, %4, %c0_i32_69, %c0_i32_70] : memref<2x16x16x128xf32, #tpu.memory_space<any>> -> memref<1x1x16x128xf32, #tpu.memory_space<any>>
      %103 = tpu.memref_squeeze %102 : memref<1x1x16x128xf32, #tpu.memory_space<any>> -> memref<1x16x128xf32, #tpu.memory_space<any>>
      %c0_i32_71 = arith.constant 0 : i32
      %c0_i32_72 = arith.constant 0 : i32
      %c0_i32_73 = arith.constant 0 : i32
      %104 = tpu.memref_slice %arg7[%c0_i32_71, %c0_i32_72, %c0_i32_73] : memref<10x16x128xf32, #tpu.memory_space<vmem>> -> memref<1x16x128xf32, #tpu.memory_space<vmem>>
      %105 = tpu.memref_slice %arg9[%c0_i32_15] : memref<2x!tpu.dma_semaphore, #tpu.memory_space<semaphore_mem>> -> memref<1x!tpu.dma_semaphore, #tpu.memory_space<semaphore_mem>>
      %106 = tpu.memref_squeeze %105 : memref<1x!tpu.dma_semaphore, #tpu.memory_space<semaphore_mem>> -> memref<!tpu.dma_semaphore, #tpu.memory_space<semaphore_mem>>
      tpu.wait_dma2 semaphore(%106 : memref<!tpu.dma_semaphore, #tpu.memory_space<semaphore_mem>>) src(%103 : memref<1x16x128xf32, #tpu.memory_space<any>>) dst(%104 : memref<1x16x128xf32, #tpu.memory_space<vmem>>)
    } else {
    }
    %23 = arith.extui %2 : i1 to i32
    %c1_i32_17 = arith.constant 1 : i32
    %c0_i32_18 = arith.constant 0 : i32
    %24 = arith.cmpi ne, %23, %c0_i32_18 : i32
    scf.if %24 {
      %c0_i32_69 = arith.constant 0 : i32
      %c0_i32_70 = arith.constant 0 : i32
      %102 = tpu.memref_slice %arg3[%arg0, %6, %c0_i32_69, %c0_i32_70] : memref<2x16x16x128xf32, #tpu.memory_space<any>> -> memref<1x1x16x128xf32, #tpu.memory_space<any>>
      %103 = tpu.memref_squeeze %102 : memref<1x1x16x128xf32, #tpu.memory_space<any>> -> memref<1x16x128xf32, #tpu.memory_space<any>>
      %c9_i32 = arith.constant 9 : i32
      %c0_i32_71 = arith.constant 0 : i32
      %c0_i32_72 = arith.constant 0 : i32
      %104 = tpu.memref_slice %arg7[%c9_i32, %c0_i32_71, %c0_i32_72] : memref<10x16x128xf32, #tpu.memory_space<vmem>> -> memref<1x16x128xf32, #tpu.memory_space<vmem>>
      %105 = tpu.memref_slice %arg9[%c1_i32_17] : memref<2x!tpu.dma_semaphore, #tpu.memory_space<semaphore_mem>> -> memref<1x!tpu.dma_semaphore, #tpu.memory_space<semaphore_mem>>
      %106 = tpu.memref_squeeze %105 : memref<1x!tpu.dma_semaphore, #tpu.memory_space<semaphore_mem>> -> memref<!tpu.dma_semaphore, #tpu.memory_space<semaphore_mem>>
      tpu.wait_dma2 semaphore(%106 : memref<!tpu.dma_semaphore, #tpu.memory_space<semaphore_mem>>) src(%103 : memref<1x16x128xf32, #tpu.memory_space<any>>) dst(%104 : memref<1x16x128xf32, #tpu.memory_space<vmem>>)
    } else {
    }
    %cst_19 = arith.constant 0.000000e+00 : f32
    %25 = vector.broadcast %cst_19 : f32 to vector<8x16x128xf32>
    %c0_20 = arith.constant 0 : index
    %c0_21 = arith.constant 0 : index
    %c0_22 = arith.constant 0 : index
    %26 = vector.load %arg8[%c0_20, %c0_21, %c0_22] : memref<8x16x128xf32, #tpu.memory_space<vmem>>, vector<8x16x128xf32>
    tpu.vector_store %arg8[%c0_20, %c0_21, %c0_22], %25 {strides = array<i32>} : memref<8x16x128xf32, #tpu.memory_space<vmem>>, vector<8x16x128xf32>,
    %c0_23 = arith.constant 0 : index
    %c0_24 = arith.constant 0 : index
    %c0_25 = arith.constant 0 : index
    %27 = vector.load %arg4[%c0_23, %c0_24, %c0_25] : memref<1x9x128xf32, #tpu.memory_space<vmem>>, vector<1x9x128xf32>
    %28 = tpu.iota {dimensions = array<i32: 1>} : vector<10x16x128xi32>
    %c0_26 = arith.constant 0 : index
    %c0_27 = arith.constant 0 : index
    %c0_28 = arith.constant 0 : index
    %29 = vector.load %arg7[%c0_26, %c0_27, %c0_28] : memref<10x16x128xf32, #tpu.memory_space<vmem>>, vector<10x16x128xf32>
    %c1_i32_29 = arith.constant 1 : i32
    %30 = tpu.dynamic_rotate %29 by %c1_i32_29 dim 1 : vector<10x16x128xf32>, i32 -> vector<10x16x128xf32>
    %c1_i32_30 = arith.constant 1 : i32
    %31 = vector.broadcast %c1_i32_30 : i32 to vector<10x16x128xi32>
    %32 = arith.cmpi sge, %28, %31 : vector<10x16x128xi32>
    %c0_i32_31 = arith.constant 0 : i32
    %33 = arith.sitofp %c0_i32_31 : i32 to f32
    %34 = vector.broadcast %33 : f32 to vector<10x16x128xf32>
    %35 = arith.select %32, %30, %34 : vector<10x16x128xi1>, vector<10x16x128xf32>
    %36 = vector.extract_strided_slice %27 {offsets = [0, 0, 0], sizes = [1, 1, 128], strides = [1, 1, 1]} : vector<1x9x128xf32> to vector<1x1x128xf32>
    %37 = vector.extract_strided_slice %35 {offsets = [0, 0, 0], sizes = [8, 16, 128], strides = [1, 1, 1]} : vector<10x16x128xf32> to vector<8x16x128xf32>
    %38 = vector.broadcast %36 : vector<1x1x128xf32> to vector<8x16x128xf32>
    %39 = arith.mulf %37, %38 : vector<8x16x128xf32>
    %40 = vector.extract_strided_slice %27 {offsets = [0, 3, 0], sizes = [1, 1, 128], strides = [1, 1, 1]} : vector<1x9x128xf32> to vector<1x1x128xf32>
    %41 = vector.extract_strided_slice %35 {offsets = [1, 0, 0], sizes = [8, 16, 128], strides = [1, 1, 1]} : vector<10x16x128xf32> to vector<8x16x128xf32>
    %42 = vector.broadcast %40 : vector<1x1x128xf32> to vector<8x16x128xf32>
    %43 = arith.mulf %41, %42 : vector<8x16x128xf32>
    %44 = arith.addf %39, %43 : vector<8x16x128xf32>
    %45 = vector.extract_strided_slice %27 {offsets = [0, 6, 0], sizes = [1, 1, 128], strides = [1, 1, 1]} : vector<1x9x128xf32> to vector<1x1x128xf32>
    %46 = vector.extract_strided_slice %35 {offsets = [2, 0, 0], sizes = [8, 16, 128], strides = [1, 1, 1]} : vector<10x16x128xf32> to vector<8x16x128xf32>
    %47 = vector.broadcast %45 : vector<1x1x128xf32> to vector<8x16x128xf32>
    %48 = arith.mulf %46, %47 : vector<8x16x128xf32>
    %49 = arith.addf %44, %48 : vector<8x16x128xf32>
    %c0_32 = arith.constant 0 : index
    %c0_33 = arith.constant 0 : index
    %c0_34 = arith.constant 0 : index
    %50 = vector.load %arg8[%c0_32, %c0_33, %c0_34] : memref<8x16x128xf32, #tpu.memory_space<vmem>>, vector<8x16x128xf32>
    %51 = arith.addf %50, %49 : vector<8x16x128xf32>
    %c0_35 = arith.constant 0 : index
    %c0_36 = arith.constant 0 : index
    %c0_37 = arith.constant 0 : index
    %52 = vector.load %arg8[%c0_35, %c0_36, %c0_37] : memref<8x16x128xf32, #tpu.memory_space<vmem>>, vector<8x16x128xf32>
    tpu.vector_store %arg8[%c0_35, %c0_36, %c0_37], %51 {strides = array<i32>} : memref<8x16x128xf32, #tpu.memory_space<vmem>>, vector<8x16x128xf32>,
    %c0_38 = arith.constant 0 : index
    %c0_39 = arith.constant 0 : index
    %c0_40 = arith.constant 0 : index
    %53 = vector.load %arg7[%c0_38, %c0_39, %c0_40] : memref<10x16x128xf32, #tpu.memory_space<vmem>>, vector<10x16x128xf32>
    %54 = vector.extract_strided_slice %27 {offsets = [0, 1, 0], sizes = [1, 1, 128], strides = [1, 1, 1]} : vector<1x9x128xf32> to vector<1x1x128xf32>
    %55 = vector.extract_strided_slice %53 {offsets = [0, 0, 0], sizes = [8, 16, 128], strides = [1, 1, 1]} : vector<10x16x128xf32> to vector<8x16x128xf32>
    %56 = vector.broadcast %54 : vector<1x1x128xf32> to vector<8x16x128xf32>
    %57 = arith.mulf %55, %56 : vector<8x16x128xf32>
    %58 = vector.extract_strided_slice %27 {offsets = [0, 4, 0], sizes = [1, 1, 128], strides = [1, 1, 1]} : vector<1x9x128xf32> to vector<1x1x128xf32>
    %59 = vector.extract_strided_slice %53 {offsets = [1, 0, 0], sizes = [8, 16, 128], strides = [1, 1, 1]} : vector<10x16x128xf32> to vector<8x16x128xf32>
    %60 = vector.broadcast %58 : vector<1x1x128xf32> to vector<8x16x128xf32>
    %61 = arith.mulf %59, %60 : vector<8x16x128xf32>
    %62 = arith.addf %57, %61 : vector<8x16x128xf32>
    %63 = vector.extract_strided_slice %27 {offsets = [0, 7, 0], sizes = [1, 1, 128], strides = [1, 1, 1]} : vector<1x9x128xf32> to vector<1x1x128xf32>
    %64 = vector.extract_strided_slice %53 {offsets = [2, 0, 0], sizes = [8, 16, 128], strides = [1, 1, 1]} : vector<10x16x128xf32> to vector<8x16x128xf32>
    %65 = vector.broadcast %63 : vector<1x1x128xf32> to vector<8x16x128xf32>
    %66 = arith.mulf %64, %65 : vector<8x16x128xf32>
    %67 = arith.addf %62, %66 : vector<8x16x128xf32>
    %c0_41 = arith.constant 0 : index
    %c0_42 = arith.constant 0 : index
    %c0_43 = arith.constant 0 : index
    %68 = vector.load %arg8[%c0_41, %c0_42, %c0_43] : memref<8x16x128xf32, #tpu.memory_space<vmem>>, vector<8x16x128xf32>
    %69 = arith.addf %68, %67 : vector<8x16x128xf32>
    %c0_44 = arith.constant 0 : index
    %c0_45 = arith.constant 0 : index
    %c0_46 = arith.constant 0 : index
    %70 = vector.load %arg8[%c0_44, %c0_45, %c0_46] : memref<8x16x128xf32, #tpu.memory_space<vmem>>, vector<8x16x128xf32>
    tpu.vector_store %arg8[%c0_44, %c0_45, %c0_46], %69 {strides = array<i32>} : memref<8x16x128xf32, #tpu.memory_space<vmem>>, vector<8x16x128xf32>,
    %c0_47 = arith.constant 0 : index
    %c0_48 = arith.constant 0 : index
    %c0_49 = arith.constant 0 : index
    %71 = vector.load %arg7[%c0_47, %c0_48, %c0_49] : memref<10x16x128xf32, #tpu.memory_space<vmem>>, vector<10x16x128xf32>
    %c15_i32_50 = arith.constant 15 : i32
    %72 = tpu.dynamic_rotate %71 by %c15_i32_50 dim 1 : vector<10x16x128xf32>, i32 -> vector<10x16x128xf32>
    %c15_i32_51 = arith.constant 15 : i32
    %73 = vector.broadcast %c15_i32_51 : i32 to vector<10x16x128xi32>
    %74 = arith.cmpi slt, %28, %73 : vector<10x16x128xi32>
    %c0_i32_52 = arith.constant 0 : i32
    %75 = arith.sitofp %c0_i32_52 : i32 to f32
    %76 = vector.broadcast %75 : f32 to vector<10x16x128xf32>
    %77 = arith.select %74, %72, %76 : vector<10x16x128xi1>, vector<10x16x128xf32>
    %78 = vector.extract_strided_slice %27 {offsets = [0, 2, 0], sizes = [1, 1, 128], strides = [1, 1, 1]} : vector<1x9x128xf32> to vector<1x1x128xf32>
    %79 = vector.extract_strided_slice %77 {offsets = [0, 0, 0], sizes = [8, 16, 128], strides = [1, 1, 1]} : vector<10x16x128xf32> to vector<8x16x128xf32>
    %80 = vector.broadcast %78 : vector<1x1x128xf32> to vector<8x16x128xf32>
    %81 = arith.mulf %79, %80 : vector<8x16x128xf32>
    %82 = vector.extract_strided_slice %27 {offsets = [0, 5, 0], sizes = [1, 1, 128], strides = [1, 1, 1]} : vector<1x9x128xf32> to vector<1x1x128xf32>
    %83 = vector.extract_strided_slice %77 {offsets = [1, 0, 0], sizes = [8, 16, 128], strides = [1, 1, 1]} : vector<10x16x128xf32> to vector<8x16x128xf32>
    %84 = vector.broadcast %82 : vector<1x1x128xf32> to vector<8x16x128xf32>
    %85 = arith.mulf %83, %84 : vector<8x16x128xf32>
    %86 = arith.addf %81, %85 : vector<8x16x128xf32>
    %87 = vector.extract_strided_slice %27 {offsets = [0, 8, 0], sizes = [1, 1, 128], strides = [1, 1, 1]} : vector<1x9x128xf32> to vector<1x1x128xf32>
    %88 = vector.extract_strided_slice %77 {offsets = [2, 0, 0], sizes = [8, 16, 128], strides = [1, 1, 1]} : vector<10x16x128xf32> to vector<8x16x128xf32>
    %89 = vector.broadcast %87 : vector<1x1x128xf32> to vector<8x16x128xf32>
    %90 = arith.mulf %88, %89 : vector<8x16x128xf32>
    %91 = arith.addf %86, %90 : vector<8x16x128xf32>
    %c0_53 = arith.constant 0 : index
    %c0_54 = arith.constant 0 : index
    %c0_55 = arith.constant 0 : index
    %92 = vector.load %arg8[%c0_53, %c0_54, %c0_55] : memref<8x16x128xf32, #tpu.memory_space<vmem>>, vector<8x16x128xf32>
    %93 = arith.addf %92, %91 : vector<8x16x128xf32>
    %c0_56 = arith.constant 0 : index
    %c0_57 = arith.constant 0 : index
    %c0_58 = arith.constant 0 : index
    %94 = vector.load %arg8[%c0_56, %c0_57, %c0_58] : memref<8x16x128xf32, #tpu.memory_space<vmem>>, vector<8x16x128xf32>
    tpu.vector_store %arg8[%c0_56, %c0_57, %c0_58], %93 {strides = array<i32>} : memref<8x16x128xf32, #tpu.memory_space<vmem>>, vector<8x16x128xf32>,
    %c0_59 = arith.constant 0 : index
    %c0_60 = arith.constant 0 : index
    %c0_61 = arith.constant 0 : index
    %95 = vector.load %arg5[%c0_59, %c0_60, %c0_61] : memref<1x1x128xf32, #tpu.memory_space<vmem>>, vector<1x1x128xf32>
    %c0_62 = arith.constant 0 : index
    %c0_63 = arith.constant 0 : index
    %c0_64 = arith.constant 0 : index
    %96 = vector.load %arg8[%c0_62, %c0_63, %c0_64] : memref<8x16x128xf32, #tpu.memory_space<vmem>>, vector<8x16x128xf32>
    %97 = vector.broadcast %95 : vector<1x1x128xf32> to vector<8x16x128xf32>
    %98 = arith.addf %96, %97 : vector<8x16x128xf32>
    %c0_65 = arith.constant 0 : index
    %c0_66 = arith.constant 0 : index
    %c0_67 = arith.constant 0 : index
    %c0_68 = arith.constant 0 : index
    %99 = vector.load %arg6[%c0_65, %c0_66, %c0_67, %c0_68] : memref<1x8x16x128xf32, #tpu.memory_space<vmem>>, vector<1x8x16x128xf32>
    %100 = vector.shape_cast %99 : vector<1x8x16x128xf32> to vector<8x16x128xf32>
    %101 = vector.shape_cast %98 : vector<8x16x128xf32> to vector<1x8x16x128xf32>
    tpu.vector_store %arg6[%c0_65, %c0_66, %c0_67, %c0_68], %101 {strides = array<i32>} : memref<1x8x16x128xf32, #tpu.memory_space<vmem>>, vector<1x8x16x128xf32>,
    return
  }
  func.func @transform_0(%arg0: i32, %arg1: i32) -> (i32, i32, i32, i32) {
    %c0_i32 = arith.constant 0 : i32
    %c0_i32_0 = arith.constant 0 : i32
    %c0_i32_1 = arith.constant 0 : i32
    return %arg0, %arg1, %c0_i32, %c0_i32_0 : i32, i32, i32, i32
  }
  func.func @transform_2(%arg0: i32, %arg1: i32) -> (i32, i32, i32) {
    %c1_i32 = arith.constant 1 : i32
    %c0_i32 = arith.constant 0 : i32
    %0 = arith.cmpi eq, %c1_i32, %c0_i32 : i32
    %c1_i32_0 = arith.constant 1 : i32
    %1 = arith.select %0, %c1_i32_0, %c1_i32 : i32
    %2 = arith.remsi %arg0, %1 : i32
    %c0_i32_1 = arith.constant 0 : i32
    %3 = arith.cmpi ne, %2, %c0_i32_1 : i32
    %c0_i32_2 = arith.constant 0 : i32
    %4 = arith.cmpi slt, %2, %c0_i32_2 : i32
    %c0_i32_3 = arith.constant 0 : i32
    %5 = arith.cmpi slt, %1, %c0_i32_3 : i32
    %6 = arith.xori %4, %5 : i1
    %7 = arith.andi %6, %3 : i1
    %8 = arith.addi %2, %1 : i32
    %9 = arith.select %7, %8, %2 : i32
    %c0_i32_4 = arith.constant 0 : i32
    %c0_i32_5 = arith.constant 0 : i32
    %c0_i32_6 = arith.constant 0 : i32
    return %9, %c0_i32_4, %c0_i32_5 : i32, i32, i32
  }
  func.func @transform_3(%arg0: i32, %arg1: i32) -> (i32, i32, i32) {
    %c1_i32 = arith.constant 1 : i32
    %c0_i32 = arith.constant 0 : i32
    %0 = arith.cmpi eq, %c1_i32, %c0_i32 : i32
    %c1_i32_0 = arith.constant 1 : i32
    %1 = arith.select %0, %c1_i32_0, %c1_i32 : i32
    %2 = arith.remsi %arg0, %1 : i32
    %c0_i32_1 = arith.constant 0 : i32
    %3 = arith.cmpi ne, %2, %c0_i32_1 : i32
    %c0_i32_2 = arith.constant 0 : i32
    %4 = arith.cmpi slt, %2, %c0_i32_2 : i32
    %c0_i32_3 = arith.constant 0 : i32
    %5 = arith.cmpi slt, %1, %c0_i32_3 : i32
    %6 = arith.xori %4, %5 : i1
    %7 = arith.andi %6, %3 : i1
    %8 = arith.addi %2, %1 : i32
    %9 = arith.select %7, %8, %2 : i32
    %c0_i32_4 = arith.constant 0 : i32
    %c0_i32_5 = arith.constant 0 : i32
    %c0_i32_6 = arith.constant 0 : i32
    return %9, %c0_i32_4, %c0_i32_5 : i32, i32, i32
  }
  func.func @transform_4(%arg0: i32, %arg1: i32) -> (i32, i32, i32, i32) {
    %c0_i32 = arith.constant 0 : i32
    %c0_i32_0 = arith.constant 0 : i32
    %c0_i32_1 = arith.constant 0 : i32
    return %arg0, %arg1, %c0_i32, %c0_i32_0 : i32, i32, i32, i32
  }
}

</mosaic_0001>

<bundles_post_ra>
// kernel: tpu_custom_call.1
= control target key start
LH: loop header
LB: loop body
LE: loop exit
PB: predicated region body
PF: predicated region fallthrough
CT: control target
= control target key end

     0   :  { %s2365_s0 = inlined_call_operand.hbm [shape: f32[2,16,16,128], index: 0, kind: input, shape index: {}]   ;;  %s2366_s1 = inlined_call_operand.hbm [shape: f32[2,16,16,128], index: 1, kind: input, shape index: {}]   ;;  %s2367_s2 = inlined_call_operand.vmem [shape: f32[1,9,128], index: 2, kind: input, shape index: {}]   ;;  %s2368_s3 = inlined_call_operand.vmem [shape: f32[1,1,128], index: 3, kind: input, shape index: {}]   ;;  %s2369_s4 = inlined_call_operand.hbm [shape: f32[2,16,16,128], index: 4, kind: output, shape index: {}]  }
   0x1   :  { %2376 = sst [smem:[#allocation22_spill]] %s2365_s0 }
   0x2   :  { %9 = vsyncpa [#allocation6], 0 }
   0x3   :  { %11 = vsyncpa [#allocation6 + $0x1], 0 }
   0x4   :  { %12 = vsyncpa [#allocation7], 0 }
   0x5   :  { %14 = vsyncpa [#allocation7 + $0x1], 0  ;;  %s1499_s15 = smov 0   ;;  %s1501_s16 = smov 0  }
   0x6   :  { %s1503_s17 = smov 0   ;;  %s1505_s18 = smov 0  }
   0x7   :  { %s1507_s19 = smov 0   ;;  %s1509_s20 = smov 0  }
   0x8   :  { %s1511_s21 = smov 0   ;;  %s1513_s22 = smov 0  }
   0x9 LB: > { %2377 = sst [smem:[#allocation19_spill]] %s1458_s21  ;;  %s1133_s23 = sadd.s32 4294967295, %s1462_s22   ;;  %s1462_s22 = sphi %s1513_s22, %s20_s22   ;;  %s1458_s21 = sphi %s1511_s21, %s2394_s21   ;;  %s1454_s20 = sphi %s1509_s20, %s2399_s20   ;;  %s1450_s19 = sphi %s1507_s19, %s2392_s19   ;;  %s1446_s18 = sphi %s1505_s18, %s2398_s18   ;;  %s1442_s17 = sphi %s1503_s17, %s2397_s17   ;;  %s1438_s16 = sphi %s1501_s16, %s2396_s16   ;;  %s1434_s15 = sphi %s1499_s15, %s2395_s15  }
   0xa   : > { %s1134_s24 = sadd.s32 4294967294, %s1462_s22   ;;  %s29_s25 = sadd.s32 1, %s1454_s20 }
   0xb   : > { %s32_s26 = sadd.s32 1, %s1458_s21  ;;  %p30_p0 = scmp.ge.s32.totalorder %s29_s25, 2 }
   0xc   : > { %s41_s27 = sadd.s32 1, %s1442_s17  ;;  %p48_p1 = scmp.ne.s32.totalorder %s1442_s17, %s1438_s16 }
   0xd   : > { %p49_p2 = scmp.eq.s32.totalorder %s1462_s22, 0  ;;  %s2401_s25 = smov (%p30_p0, %s29_s25), 0 }
   0xe   : > { %2378 = sst [smem:[#allocation20_spill]] %s2401_s25  ;;  %s2403_s26 = smov (!%p30_p0, %s32_s26), %s1458_s21 }
   0xf   : > { %s37_s28 = ssub.s32 %s1454_s20, %s2401_s25  ;;  %p1552_p3 = por %p49_p2, %p48_p1 }
  0x10   : > { %p34_p4 = scmp.ge.s32.totalorder %s2403_s26, 2  ;;  %p54_p5 = scmp.ne.s32.totalorder %s1438_s16, %s1434_s15 }
  0x11   : > { %p55_p6 = scmp.eq.s32.totalorder %s1133_s23, 0  ;;  %p122_p7 = scmp.eq.s32.totalorder %s1133_s23, 3 }
  0x12   : > { %s2405_s26 = smov (%p34_p4, %s2403_s26), 0  ;;  %p128_p10 = scmp.eq.s32.totalorder %s1134_s24, 3 }
  0x13   : > { %2380 = sst [smem:[#allocation21_spill]] %s2405_s26  ;;  %p1560_p8 = por %p55_p6, %p54_p5 }
  0x14   : > { %p1564_p9 = por %p122_p7, %p48_p1  ;;  %s36_s6 = ssub.s32 %s1458_s21, %s2405_s26 }
  0x15   : > { %s38_s7 = sor.u32 %s37_s28, %s36_s6  ;;  %p1570_p12 = por %p128_p10, %p54_p5 }
  0x16   : > { %s2382_s5 = scalar_select %p1564_p9, 1, 0 }
  0x17   : > { %p39_p11 = scmp.eq.s32.totalorder %s38_s7, 0  ;;  %p1192_p13 = scmp.lt.s32.totalorder %s1462_s22, 4 }
  0x18   : > { %s2383_s8 = scalar_select %p1570_p12, 1, 0 }
  0x19   : > { %s154_s9 = sand.u32 1, %s1442_s17   ;;  %s1170_s12 = sshll.u32 %s1454_s20, 4 }
  0x1a   : > { %s1577_s10 = scalar_select %p39_p11, %s1442_s17, %s41_s27  }
  0x1b   : > { %s1137_s11 = sshll.u32 %s154_s9, 7  ;;  %s1140_s13 = sshll.u32 %s1458_s21, 5 }
  0x1c   : > { %s158_s14 = scalar_lea.vmem [#allocation5], %s1137_s11  ;;  %s165_s25 = sadd.s32 %s1170_s12, %s1140_s13 }
  0x1d   : > { %s168_s23 = sshll.u32 %s158_s14, 4  ;;  %s1141_s26 = sshll.u32 %s165_s25, 7  ;;  %s1581_s23 = int_to_ptr.vmem [resolvable:$true] %s168_s23 }
  0x1e   : > { %p1585_p0 = pnand %p1192_p13, %p1552_p3  ;;  %s2385_s0 = sld [smem:[#allocation22_spill]] }
  0x1f   : > { %s1594_s7 = scalar_lea.sflag [#allocation6], %s154_s9 }
  0x20   : > { %p1272_p2 = pneg %p1585_p0 }
  0x24   : > { %s1592_s27 = scalar_lea.hbm %s2385_s0, %s1141_s26  ;;  %s1275_s12 = scalar_lea.hbm %s2385_s0, 8192 }
  0x25   : > { %s1270_s11 = scalar_lea.hbm %s1592_s27, 2048  ;;  %p1276_p5 = scmp.lt.u32.totalorder %s1592_s27, %s2385_s0 }
  0x26   : > { %p1271_p1 = scmp.ne.s32.totalorder %s1592_s27, %s1270_s11  ;;  %p1277_p6 = scmp.lt.u32.totalorder %s1275_s12, %s1270_s11 }
  0x27   : > { %p1279_p10 = scmp.lt.u32.totalorder %s1270_s11, %s1592_s27 }
  0x28   : > { %p1273_p3 = pnand %p1272_p2, %p1271_p1  ;;  %p1278_p7 = por %p1277_p6, %p1276_p5 }
  0x2a   : > { %p1274_p4 = pneg %p1273_p3  ;;  %p1280_p11 = por %p1279_p10, %p1278_p7 }
  0x2c   : > { %p1281_p13 = pnand %p1280_p11, %p1274_p4 }
  0x2e   : > { %1284 = shalt.err (!%p1281_p13)
}
  0x2f   : > { %s1285_s9 = scalar_lea.vmem %s1581_s23, 2048  ;;  %s1464_s14 = smov [#allocation5]  }
  0x30   : > { %p1286_p1 = scmp.ne.s32.totalorder %s1581_s23, %s1285_s9  ;;  %s1290_s28 = sshll.u32 %s1464_s14, 4  ;;  %s1291_s28 = int_to_ptr.vmem [resolvable:$false] %s1290_s28 }
  0x31   : > { %s1292_s6 = scalar_lea.vmem %s1291_s28, 4096  ;;  %p1293_p9 = scmp.lt.s32.totalorder %s1581_s23, %s1291_s28 }
  0x32   : > { %p1288_p3 = pnand %p1286_p1, %p1272_p2  ;;  %p1294_p5 = scmp.lt.s32.totalorder %s1292_s6, %s1285_s9 }
  0x34   : > { %p1289_p12 = pneg %p1288_p3  ;;  %p1295_p6 = por %p1294_p5, %p1293_p9 }
  0x36   : > { %p1296_p7 = pnand %p1295_p6, %p1289_p12 }
  0x38   : > { %1299 = shalt.err (!%p1296_p7)
}
  0x39   : > { %s1465_s11 = smov 128   ;;  %s1466_s25 = smov 8  }
  0x3a   : > { %1187 = dma.hbm_to_vmem [thread:$0]  (!%p1585_p0), %s1592_s27, 2048, %s1581_s23, %s1594_s7, %s1465_s11, %s1465_s11, %s1466_s25  }
  0x3b   : > { %p1142_p2 = scmp.ge.s32.totalorder %s1462_s22, 1  ;;  %p176_p4 = scmp.lt.s32.totalorder %s1462_s22, 5 }
  0x3d   : > { %p177_p10 = pnand %p1142_p2, %p176_p4 }
  0x3e   : > { %s1625_s29 = sand.u32 (!%p177_p10), 1, %s1438_s16  }
  0x3f   : > { %180 = sbr.rel (%p177_p10) target bundleno = 274 (0x112), region = 32  ;;  %s2373_s12 = sshll.u32 (!%p177_p10), %s1625_s29, 7 }
  0x40   : > { %s183_s26 = scalar_lea.sflag (!%p177_p10), [#allocation6], %s1625_s29  ;;  %s1631_s13 = scalar_lea.vmem (!%p177_p10), [#allocation5], %s2373_s12 }
  0x46   : > { %1417 = dma.done.wait (%p1560_p8), %s183_s26, 2048  }
  0x47   : > { %1419 = vsyncadd (%p1560_p8), %s183_s26, 4294965248  ;;  %s1145_s23 = sshll.u32 %s1446_s18, 3  ;;  %p2375_p0 = scmp.gt.s32.totalorder %s1446_s18, 0 }
  0x48   : > { %s1146_s24 = sadd.s32 4294967295, %s1145_s23  ;;  %s217_s27 = sadd.s32 8, %s1145_s23 }
  0x49   : > { %p215_p9 = scmp.gt.s32.totalorder %s1146_s24, 0  ;;  %p218_p12 = scmp.lt.s32.totalorder %s217_s27, 15 }
  0x4a   : > { %s1149_s9 = sshll.u32 %s1450_s19, 8  ;;  %s1467_s28 = smov [#allocation2]  }
  0x4b   : > { %s2407_s24 = smov (!%p215_p9, %s1146_s24), 0  ;;  %s2409_s27 = smov (!%p218_p12, %s217_s27), 15 }
  0x4c   : > { %s1148_s7 = sshll.u32 %s2407_s24, 4  ;;  %s235_s6 = sshll.u32 %s1467_s28, 4  ;;  %s1647_s6 = int_to_ptr.vmem [resolvable:$true] %s235_s6 }
  0x4d   : > { %s225_s14 = sadd.s32 %s1149_s9, %s1148_s7  ;;  %s1304_s24 = scalar_lea.hbm %s2366_s1, 8192 }
  0x4e   : > { %s1150_s30 = sshll.u32 %s225_s14, 4 }
  0x4f   : > { %s227_s26 = scalar_lea.hbm %s2366_s1, %s1150_s30 }
  0x50   : > { %s1300_s23 = scalar_lea.hbm %s227_s26, 256  ;;  %p1305_p1 = scmp.lt.u32.totalorder %s227_s26, %s2366_s1 }
  0x51   : > { %p1301_p8 = scmp.ne.s32.totalorder %s227_s26, %s1300_s23  ;;  %p1306_p3 = scmp.lt.u32.totalorder %s1304_s24, %s1300_s23 }
  0x52   : > { %p1308_p6 = scmp.lt.u32.totalorder %s1300_s23, %s227_s26 }
  0x53   : > { %p1302_p11 = pnand %p1301_p8, %p2375_p0  ;;  %p1307_p5 = por %p1306_p3, %p1305_p1 }
  0x55   : > { %p1303_p13 = pneg %p1302_p11  ;;  %p1309_p7 = por %p1308_p6, %p1307_p5 }
  0x57   : > { %p1310_p2 = pnand %p1309_p7, %p1303_p13 }
  0x59   : > { %1313 = shalt.err (!%p1310_p2)  }
  0x5a   : > { %s1314_s0 = scalar_lea.vmem %s1647_s6, 256  ;;  %s1320_s21 = scalar_lea.vmem %s1647_s6, 2560 }
  0x5b   : > { %p1315_p4 = scmp.ne.s32.totalorder %s1647_s6, %s1314_s0  ;;  %p1321_p12 = scmp.lt.s32.totalorder %s1647_s6, %s1647_s6 }
  0x5c   : > { %p1322_p8 = scmp.lt.s32.totalorder %s1320_s21, %s1314_s0 }
  0x5d   : > { %p1316_p10 = pnand %p1315_p4, %p2375_p0 }
  0x5e   : > { %p1323_p11 = por %p1322_p8, %p1321_p12 }
  0x5f   : > { %p1317_p9 = pneg %p1316_p10 }
  0x61   : > { %p1324_p1 = pnand %p1323_p11, %p1317_p9 }
  0x63   : > { %1327 = shalt.err (!%p1324_p1)  }
  0x64   : > { %1175 = dma.hbm_to_vmem [thread:$0]  (%p2375_p0), %s227_s26, 256, %s1647_s6, [#allocation4]  ;;  %v260_v0 = vld [vmem:[%s1631_s13] sm:$0xff]  ;;  %v261_v1 = vld [vmem:[%s1631_s13 + $0x8] sm:$0xff]  ;;  %v262_v2 = vld [vmem:[%s1631_s13 + $0x10] sm:$0xff] }
  0x65   : > { %s1152_s12 = sshll.u32 %s2409_s27, 4  ;;  %p1194_p13 = scmp.lt.s32.totalorder %s1446_s18, 1  ;;  %v263_v3 = vld [vmem:[%s1631_s13 + $0x18] sm:$0xff]  ;;  %v264_v4 = vld [vmem:[%s1631_s13 + $0x20] sm:$0xff]  ;;  %v265_v5 = vld [vmem:[%s1631_s13 + $0x28] sm:$0xff] }
  0x66   : > { %s244_s30 = sadd.s32 %s1152_s12, %s1149_s9  ;;  %v266_v6 = vld [vmem:[%s1631_s13 + $0x30] sm:$0xff]  ;;  %v267_v7 = vld [vmem:[%s1631_s13 + $0x38] sm:$0xff]  ;;  %v268_v8 = vld [vmem:[%s1631_s13 + $0x40] sm:$0xff]  ;;  %s1468_s26 = smov [#allocation2 + $0x90]  }
  0x67   : > { %v269_v9 = vld [vmem:[%s1631_s13 + $0x48] sm:$0xff]  ;;  %s1154_s11 = sshll.u32 %s244_s30, 4  ;;  %v270_v10 = vld [vmem:[%s1631_s13 + $0x50] sm:$0xff]  ;;  %v271_v11 = vld [vmem:[%s1631_s13 + $0x58] sm:$0xff]  ;;  %s256_s23 = sshll.u32 %s1468_s26, 4  ;;  %s257_s23 = int_to_ptr.vmem [resolvable:$true] %s256_s23 }
  0x68   : > { %v272_v12 = vld [vmem:[%s1631_s13 + $0x60] sm:$0xff]  ;;  %s246_s25 = scalar_lea.hbm %s2366_s1, %s1154_s11  ;;  %v273_v13 = vld [vmem:[%s1631_s13 + $0x68] sm:$0xff]  ;;  %v274_v14 = vld [vmem:[%s1631_s13 + $0x70] sm:$0xff] }
  0x69   : > { %v275_v15 = vld [vmem:[%s1631_s13 + $0x78] sm:$0xff]  ;;  %s1328_s7 = scalar_lea.hbm %s246_s25, 256  ;;  %p1333_p7 = scmp.lt.u32.totalorder %s246_s25, %s2366_s1 }
  0x6a   : > { %p1329_p3 = scmp.ne.s32.totalorder %s246_s25, %s1328_s7  ;;  %p1334_p2 = scmp.lt.u32.totalorder %s1304_s24, %s1328_s7 }
  0x6b   : > { %p1336_p10 = scmp.lt.u32.totalorder %s1328_s7, %s246_s25 }
  0x6c   : > { %p1330_p5 = pnand %p1329_p3, %p1194_p13  ;;  %p1335_p4 = por %p1334_p2, %p1333_p7 }
  0x6e   : > { %p1331_p6 = pneg %p1330_p5  ;;  %p1337_p9 = por %p1336_p10, %p1335_p4 }
  0x70   : > { %p1338_p12 = pnand %p1337_p9, %p1331_p6 }
  0x72   : > { %1341 = shalt.err (!%p1338_p12)  }
  0x73   : > { %s1342_s13 = scalar_lea.vmem %s257_s23, 256  ;;  %p1349_p3 = scmp.lt.s32.totalorder %s257_s23, %s1647_s6 }
  0x74   : > { %p1343_p8 = scmp.ne.s32.totalorder %s257_s23, %s1342_s13  ;;  %p1350_p5 = scmp.lt.s32.totalorder %s1320_s21, %s1342_s13 }
  0x76   : > { %p1344_p11 = pnand %p1343_p8, %p1194_p13  ;;  %p1351_p0 = por %p1350_p5, %p1349_p3 }
  0x78   : > { %p1345_p1 = pneg %p1344_p11 }
  0x7a   : > { %p1352_p2 = pnand %p1351_p0, %p1345_p1 }
  0x7c   : > { %1355 = shalt.err (!%p1352_p2)  }
  0x7d   : > { %1177 = dma.hbm_to_vmem [thread:$0]  (%p1194_p13), %s246_s25, 256, %s257_s23, [#allocation4 + $0x1] }
  0x7e   : > { %277 = vst [vmem:[#allocation2 + $0x10] sm:$0xff] %v260_v0  ;;  %278 = vst [vmem:[#allocation2 + $0x18] sm:$0xff] %v261_v1  ;;  %s2386_s6 = sshll.u32 %s1625_s29, 7  ;;  %p2387_p0 = scmp.gt.s32.totalorder %s1446_s18, 0 }
  0x7f   : > { %279 = vst [vmem:[#allocation2 + $0x20] sm:$0xff] %v262_v2  ;;  %280 = vst [vmem:[#allocation2 + $0x28] sm:$0xff] %v263_v3  ;;  %s1714_s24 = scalar_lea.vmem [#allocation8], %s2386_s6  ;;  %v1469_v16 = vmov (!%p2387_p0), 0.0  }
  0x80   : > { %281 = vst [vmem:[#allocation2 + $0x30] sm:$0xff] %v264_v4  ;;  %282 = vst [vmem:[#allocation2 + $0x38] sm:$0xff] %v265_v5  ;;  %296 = sbr.rel (%p2387_p0) target bundleno = 135 (0x87), region = 56 }
  0x81   : > { %283 = vst [vmem:[#allocation2 + $0x40] sm:$0xff] %v266_v6  ;;  %284 = vst [vmem:[#allocation2 + $0x48] sm:$0xff] %v267_v7 }
  0x82   : > { %285 = vst [vmem:[#allocation2 + $0x50] sm:$0xff] %v268_v8  ;;  %286 = vst [vmem:[#allocation2 + $0x58] sm:$0xff] %v269_v9 }
  0x83   : > { %287 = vst [vmem:[#allocation2 + $0x60] sm:$0xff] %v270_v10  ;;  %288 = vst [vmem:[#allocation2 + $0x68] sm:$0xff] %v271_v11 }
  0x84   : > { %289 = vst [vmem:[#allocation2 + $0x70] sm:$0xff] %v272_v12  ;;  %290 = vst [vmem:[#allocation2 + $0x78] sm:$0xff] %v273_v13 }
  0x85   : > { %291 = vst [vmem:[#allocation2 + $0x80] sm:$0xff] %v274_v14  ;;  %292 = vst [vmem:[#allocation2 + $0x88] sm:$0xff] %v275_v15 }
  0x86   : > { %297 = vst [vmem:[#allocation2] sm:$0xff] (!%p2387_p0), %v1469_v16  ;;  %298 = vst [vmem:[#allocation2 + $0x8] sm:$0xff] (!%p2387_p0), %v1469_v16 }
  0x87 PF: > { %302 = sbr.rel (%p1194_p13) target bundleno = 142 (0x8e), region = 60  ;;  %v1470_v17 = vmov (!%p1194_p13), 0.0  }
  0x88   : > { %304 = vst [vmem:[#allocation2 + $0x90] sm:$0xff] (!%p1194_p13), %v1470_v17  ;;  %305 = vst [vmem:[#allocation2 + $0x98] sm:$0xff] (!%p1194_p13), %v1470_v17 }
  0x8e PF: > { %p2388_p6 = scmp.gt.s32.totalorder %s1446_s18, 0 }
  0x90   : > { %1421 = dma.done.wait (%p2388_p6), [#allocation4], 256  ;;  %p2389_p7 = pmov %p2388_p6 }
  0x92   : > { %1423 = vsyncadd (%p2389_p7), [#allocation4], 4294967040 }
  0x93   : > { %1425 = dma.done.wait (%p1194_p13), [#allocation4 + $0x1], 256 }
  0x94   : > { %1427 = vsyncadd (%p1194_p13), [#allocation4 + $0x1], 4294967040  ;;  %v339_v18 = vlaneseq  ;;  %v337_v26 = vld [vmem:[%s2367_s2] sm:$0xff]  ;;  %v343_v31 = vld [vmem:[#allocation2 + $0x8] sm:$0xff]  ;;  %s1171_s26 = sshll.u32 %s1446_s18, 4  ;;  %s1164_s23 = sshll.u32 %s1450_s19, 5 }
  0x95   : > { %v1741_v27 = vld [vmem:[#allocation2] sm:$0xff]  ;;  %v1749_v32 = vld [vmem:[#allocation2 + $0x10] sm:$0xff]  ;;  %v1751_v33 = vld [vmem:[#allocation2 + $0x18] sm:$0xff]  ;;  %v372_v41 = vrot.slane %v343_v31, 7  ;;  %v755_v2 = vrot.slane %v343_v31, 1  ;;  %s1017_s7 = sadd.s32 %s1171_s26, %s1164_s23  ;;  %s1020_s18 = sshll.u32 %s1714_s24, 4  ;;  %s2304_s18 = int_to_ptr.vmem [resolvable:$true] %s1020_s18 }
  0x96   : > { %v1728_v19 = vshrl.u32 %v339_v18, 7  ;;  %v362_v34 = vrot.slane %v1741_v27, 7  ;;  %v1760_v38 = vld [vmem:[#allocation2 + $0x20] sm:$0xff]  ;;  %v1762_v39 = vld [vmem:[#allocation2 + $0x28] sm:$0xff]  ;;  %v363_v40 = vrot.slane %v1749_v32, 7  ;;  %v373_v42 = vrot.slane %v1751_v33, 7 }
  0x97   : > { %v364_v44 = vrot.slane %v1760_v38, 7  ;;  %v374_v45 = vrot.slane %v1762_v39, 7  ;;  %v745_v51 = vrot.slane %v1741_v27, 1  ;;  %v746_v62 = vrot.slane %v1749_v32, 1  ;;  %v1804_v0 = vld [vmem:[%s2367_s2 + $0x8] ss:$0 sm:$0xff] }
  0x98   : > { %v427_v20 = vsub.s32 0, %v1728_v19  ;;  %v447_v21 = vsub.s32 3, %v1728_v19  ;;  %v483_v22 = vsub.s32 6, %v1728_v19  ;;  %v587_v23 = vsub.s32 1, %v1728_v19  ;;  %s1165_s19 = sshll.u32 %s1017_s7, 7  ;;  %s1004_s12 = scalar_lea.sflag [#allocation7], %s1625_s29 }
  0x99   : > { %vm382_vm0 = vcmp.lt.s32.totalorder %v1728_v19, 1  ;;  %vm403_vm1 = vcmp.ge.s32.totalorder %v1728_v19, 1  ;;  %v607_v24 = vsub.s32 4, %v1728_v19  ;;  %v643_v25 = vsub.s32 7, %v1728_v19  ;;  %s2310_s0 = scalar_lea.hbm %s2369_s4, %s1165_s19  ;;  %s1356_s13 = scalar_lea.vmem %s2304_s18, 2048 }
  0x9a   : > { %vm765_vm2 = vcmp.lt.s32.totalorder %v1728_v19, 7  ;;  %v810_v28 = vsub.s32 2, %v1728_v19  ;;  %v830_v29 = vsub.s32 5, %v1728_v19  ;;  %v1747_v30 = vadd.s32 8, %v1728_v19  ;;  %p1357_p13 = scmp.ne.s32.totalorder %s2304_s18, %s1356_s13  ;;  %p2390_p4 = scmp.ne.s32.totalorder %s2382_s5, 0 }
  0x9b   : > { %v1754_v35 = vrot.slane %v337_v26, %v427_v20  ;;  %v1756_v36 = vrot.slane %v337_v26, %v447_v21  ;;  %v1758_v37 = vrot.slane %v337_v26, %v483_v22  ;;  %v1766_v43 = vrot.slane %v337_v26, %v587_v23  ;;  %s1471_s6 = smov [#allocation8]  }
  0x9c   : > { %v1770_v46 = vrot.slane %v337_v26, %v607_v24  ;;  %v1772_v47 = vrot.slane %v337_v26, %v643_v25  ;;  %v393_v48 = vsel %vm382_vm0, %v372_v41, %v362_v34  ;;  %v394_v49 = vsel %vm382_vm0, %v373_v42, %v363_v40  ;;  %p1358_p10 = pnand %p1357_p13, %p2390_p4  ;;  %s1360_s21 = sshll.u32 %s1471_s6, 4  ;;  %s1361_s21 = int_to_ptr.vmem [resolvable:$false] %s1360_s21 }
  0x9d   : > { %v589_v50 = vmul.f32 %v1766_v43, %v1741_v27  ;;  %v395_v52 = vsel %vm382_vm0, %v374_v45, %v364_v44  ;;  %v405_v53 = vsel %vm403_vm1, %v393_v48, 0.0  ;;  %v407_v54 = vsel %vm403_vm1, %v394_v49, 0.0  ;;  %s1362_s30 = scalar_lea.vmem %s1361_s21, 4096  ;;  %p1363_p12 = scmp.lt.s32.totalorder %s2304_s18, %s1361_s21 }
  0x9e   : > { %v609_v55 = vmul.f32 %v1770_v46, %v1749_v32  ;;  %v1791_v56 = vsel %vm403_vm1, %v395_v52, 0.0  ;;  %v429_v57 = vmul.f32 %v1754_v35, %v405_v53  ;;  %v449_v58 = vmul.f32 %v1756_v36, %v407_v54  ;;  %p1359_p9 = pneg %p1358_p10  ;;  %p1364_p8 = scmp.lt.s32.totalorder %s1362_s30, %s1356_s13 }
  0x9f   : > { %v645_v59 = vmul.f32 %v1772_v47, %v1760_v38  ;;  %v485_v60 = vmul.f32 %v1758_v37, %v1791_v56  ;;  %v747_v63 = vrot.slane %v1760_v38, 1  ;;  %v756_v3 = vrot.slane %v1751_v33, 1 }
  0xa0   : > { %v625_v61 = vadd.f32 %v609_v55, %v589_v50  ;;  %v465_v1 = vadd.f32 %v449_v58, %v429_v57  ;;  %v757_v4 = vrot.slane %v1762_v39, 1  ;;  %v1808_v6 = vrot.slane %v337_v26, %v810_v28  ;;  %p1365_p11 = por %p1364_p8, %p1363_p12 }
  0xa1   : > { %v1810_v7 = vrot.slane %v337_v26, %v830_v29  ;;  %v383_v8 = vsel %vm382_vm0, %v362_v34, %v372_v41  ;;  %v766_v10 = vsel %vm765_vm2, %v745_v51, %v755_v2  ;;  %v767_v11 = vsel %vm765_vm2, %v746_v62, %v756_v3 }
  0xa2   : > { %v661_v5 = vadd.f32 %v645_v59, %v625_v61  ;;  %v501_v9 = vadd.f32 %v485_v60, %v465_v1  ;;  %v1820_v12 = vsel %vm765_vm2, %v747_v63, %v757_v4  ;;  %v812_v13 = vmul.f32 %v1808_v6, %v766_v10  ;;  %p1366_p1 = pnand %p1365_p11, %p1359_p9 }
  0xa3   : > { %v832_v14 = vmul.f32 %v1810_v7, %v767_v11  ;;  %v868_v15 = vmul.f32 %v1804_v0, %v1820_v12  ;;  %v384_v16 = vsel %vm382_vm0, %v363_v40, %v373_v42  ;;  %v1830_v18 = vsel %vm382_vm0, %v364_v44, %v374_v45  ;;  %v1850_v42 = vld [vmem:[#allocation2 + $0x38] sm:$0xff]  ;;  %v1855_v44 = vld [vmem:[%s2368_s3] ss:$0 sm:$0xff] }
  0xa4   : > { %v693_v17 = vadd.f32 %v661_v5, %v501_v9  ;;  %v430_v20 = vmul.f32 %v1754_v35, %v383_v8  ;;  %v450_v21 = vmul.f32 %v1756_v36, %v384_v16  ;;  %v486_v23 = vmul.f32 %v1758_v37, %v1830_v18 }
  0xa5   : > { %v848_v22 = vadd.f32 %v832_v14, %v812_v13  ;;  %v590_v24 = vmul.f32 %v1766_v43, %v343_v31  ;;  %v610_v25 = vmul.f32 %v1770_v46, %v1751_v33  ;;  %v646_v27 = vmul.f32 %v1772_v47, %v1762_v39  ;;  %v1848_v31 = vld [vmem:[#allocation2 + $0x30] sm:$0xff] }
  0xa6   : > { %v466_v26 = vadd.f32 %v450_v21, %v430_v20  ;;  %v776_v28 = vsel %vm765_vm2, %v755_v2, %v745_v51  ;;  %v777_v29 = vsel %vm765_vm2, %v756_v3, %v746_v62  ;;  %v778_v41 = vsel %vm765_vm2, %v757_v4, %v747_v63 }
  0xa7   : > { %v884_v34 = vadd.f32 %v868_v15, %v848_v22  ;;  %v626_v40 = vadd.f32 %v610_v25, %v590_v24  ;;  %vm787_vm3 = vcmp.lt.s32.totalorder %v1747_v30, 15  ;;  %v365_v58 = vrot.slane %v1848_v31, 7 }
  0xa8   : > { %v502_v45 = vadd.f32 %v486_v23, %v466_v26  ;;  %v789_v48 = vsel %vm787_vm3, %v776_v28, 0.0  ;;  %v791_v49 = vsel %vm787_vm3, %v777_v29, 0.0  ;;  %v1863_v50 = vsel %vm787_vm3, %v778_v41, 0.0 }
  0xa9   : > { %v916_v51 = vadd.f32 %v884_v34, %v693_v17  ;;  %v662_v52 = vadd.f32 %v646_v27, %v626_v40  ;;  %v813_v53 = vmul.f32 %v1808_v6, %v789_v48  ;;  %v833_v55 = vmul.f32 %v1810_v7, %v791_v49  ;;  %v1917_v48 = vld [vmem:[#allocation2 + $0x48] sm:$0xff] }
  0xaa   : > { %v869_v57 = vmul.f32 %v1804_v0, %v1863_v50  ;;  %v375_v59 = vrot.slane %v1850_v42, 7  ;;  %v431_v60 = vmul.f32 %v1754_v35, %v407_v54  ;;  %v451_v1 = vmul.f32 %v1756_v36, %v1791_v56 }
  0xab   : > { %v971_v61 = vadd.f32 %v1855_v44, %v916_v51  ;;  %v694_v62 = vadd.f32 %v662_v52, %v502_v45  ;;  %v849_v63 = vadd.f32 %v833_v55, %v813_v53  ;;  %v591_v3 = vmul.f32 %v1766_v43, %v1749_v32  ;;  %v1915_v45 = vld [vmem:[#allocation2 + $0x40] sm:$0xff] }
  0xac   : > { %v396_v2 = vsel %vm382_vm0, %v375_v59, %v365_v58  ;;  %v611_v4 = vmul.f32 %v1770_v46, %v1760_v38  ;;  %v647_v5 = vmul.f32 %v1772_v47, %v1848_v31  ;;  %v467_v9 = vadd.f32 %v451_v1, %v431_v60 }
  0xad   : > { %987 = vst [vmem:[%s1714_s24] sm:$0xff] %v971_v61  ;;  %v885_v54 = vadd.f32 %v869_v57, %v849_v63  ;;  %v1886_v8 = vsel %vm403_vm1, %v396_v2, 0.0  ;;  %v748_v10 = vrot.slane %v1848_v31, 1  ;;  %v758_v32 = vrot.slane %v1850_v42, 1 }
  0xae   : > { %v487_v13 = vmul.f32 %v1758_v37, %v1886_v8  ;;  %v627_v14 = vadd.f32 %v611_v4, %v591_v3  ;;  %v814_v15 = vmul.f32 %v1808_v6, %v767_v11  ;;  %v834_v20 = vmul.f32 %v1810_v7, %v1820_v12 }
  0xaf   : > { %v917_v17 = vadd.f32 %v885_v54, %v694_v62  ;;  %v1897_v21 = vsel %vm382_vm0, %v365_v58, %v375_v59  ;;  %v432_v22 = vmul.f32 %v1754_v35, %v384_v16  ;;  %v1902_v25 = vsel %vm765_vm2, %v748_v10, %v758_v32 }
  0xb0   : > { %v503_v23 = vadd.f32 %v487_v13, %v467_v9  ;;  %v663_v24 = vadd.f32 %v647_v5, %v627_v14  ;;  %v452_v11 = vmul.f32 %v1756_v36, %v1830_v18  ;;  %v850_v27 = vadd.f32 %v834_v20, %v814_v15 }
  0xb1   : > { %v972_v26 = vadd.f32 %v1855_v44, %v917_v17  ;;  %v870_v28 = vmul.f32 %v1804_v0, %v1902_v25  ;;  %v488_v29 = vmul.f32 %v1758_v37, %v1897_v21  ;;  %v592_v40 = vmul.f32 %v1766_v43, %v1751_v33 }
  0xb2   : > { %v695_v34 = vadd.f32 %v663_v24, %v503_v23  ;;  %v468_v16 = vadd.f32 %v452_v11, %v432_v22  ;;  %v612_v41 = vmul.f32 %v1770_v46, %v1762_v39  ;;  %v648_v52 = vmul.f32 %v1772_v47, %v1850_v42 }
  0xb3   : > { %988 = vst [vmem:[%s1714_s24 + $0x8] sm:$0xff] %v972_v26  ;;  %v886_v51 = vadd.f32 %v870_v28, %v850_v27  ;;  %v779_v53 = vsel %vm765_vm2, %v758_v32, %v748_v10  ;;  %v815_v55 = vmul.f32 %v1808_v6, %v791_v49  ;;  %v835_v59 = vmul.f32 %v1810_v7, %v1863_v50 }
  0xb4   : > { %v504_v57 = vadd.f32 %v488_v29, %v468_v16  ;;  %v628_v58 = vadd.f32 %v612_v41, %v592_v40  ;;  %v1927_v33 = vsel %vm787_vm3, %v779_v53, 0.0  ;;  %v366_v62 = vrot.slane %v1915_v45, 7 }
  0xb5   : > { %v918_v60 = vadd.f32 %v886_v51, %v695_v34  ;;  %v871_v61 = vmul.f32 %v1804_v0, %v1927_v33  ;;  %v376_v63 = vrot.slane %v1917_v48, 7  ;;  %v851_v49 = vadd.f32 %v835_v59, %v815_v55  ;;  %v1989_v59 = vld [vmem:[#allocation2 + $0x58] sm:$0xff] }
  0xb6   : > { %v664_v1 = vadd.f32 %v648_v52, %v628_v58  ;;  %v433_v2 = vmul.f32 %v1754_v35, %v1791_v56  ;;  %v453_v3 = vmul.f32 %v1756_v36, %v1886_v8  ;;  %v593_v54 = vmul.f32 %v1766_v43, %v1760_v38  ;;  %v1980_v52 = vld [vmem:[#allocation2 + $0x50] sm:$0xff] }
  0xb7   : > { %v973_v4 = vadd.f32 %v1855_v44, %v918_v60  ;;  %v397_v5 = vsel %vm382_vm0, %v376_v63, %v366_v62  ;;  %v613_v9 = vmul.f32 %v1770_v46, %v1848_v31  ;;  %v887_v13 = vadd.f32 %v871_v61, %v851_v49 }
  0xb8   : > { %v696_v10 = vadd.f32 %v664_v1, %v504_v57  ;;  %v1948_v14 = vsel %vm403_vm1, %v397_v5, 0.0  ;;  %v469_v56 = vadd.f32 %v453_v3, %v433_v2  ;;  %v649_v17 = vmul.f32 %v1772_v47, %v1915_v45 }
  0xb9   : > { %989 = vst [vmem:[%s1714_s24 + $0x10] sm:$0xff] %v973_v4  ;;  %v489_v32 = vmul.f32 %v1758_v37, %v1948_v14  ;;  %v629_v15 = vadd.f32 %v613_v9, %v593_v54  ;;  %v749_v38 = vrot.slane %v1915_v45, 1  ;;  %v759_v22 = vrot.slane %v1917_v48, 1 }
  0xba   : > { %v919_v20 = vadd.f32 %v887_v13, %v696_v10  ;;  %v816_v23 = vmul.f32 %v1808_v6, %v1820_v12  ;;  %v836_v24 = vmul.f32 %v1810_v7, %v1902_v25  ;;  %v1963_v27 = vsel %vm382_vm0, %v366_v62, %v376_v63 }
  0xbb   : > { %v505_v11 = vadd.f32 %v489_v32, %v469_v56  ;;  %v665_v26 = vadd.f32 %v649_v17, %v629_v15  ;;  %v434_v28 = vmul.f32 %v1754_v35, %v1830_v18  ;;  %v1970_v34 = vsel %vm765_vm2, %v749_v38, %v759_v22 }
  0xbc   : > { %v974_v29 = vadd.f32 %v1855_v44, %v919_v20  ;;  %v852_v16 = vadd.f32 %v836_v24, %v816_v23  ;;  %v454_v12 = vmul.f32 %v1756_v36, %v1897_v21  ;;  %v872_v41 = vmul.f32 %v1804_v0, %v1970_v34 }
  0xbd   : > { %v697_v40 = vadd.f32 %v665_v26, %v505_v11  ;;  %v490_v51 = vmul.f32 %v1758_v37, %v1963_v27  ;;  %v594_v18 = vmul.f32 %v1766_v43, %v1762_v39  ;;  %v614_v55 = vmul.f32 %v1770_v46, %v1850_v42 }
  0xbe   : > { %990 = vst [vmem:[%s1714_s24 + $0x18] sm:$0xff] %v974_v29  ;;  %v470_v53 = vadd.f32 %v454_v12, %v434_v28  ;;  %v650_v57 = vmul.f32 %v1772_v47, %v1917_v48  ;;  %v780_v58 = vsel %vm765_vm2, %v759_v22, %v749_v38  ;;  %v888_v60 = vadd.f32 %v872_v41, %v852_v16 }
  0xbf   : > { %v1993_v61 = vsel %vm787_vm3, %v780_v58, 0.0  ;;  %v817_v39 = vmul.f32 %v1808_v6, %v1863_v50  ;;  %v837_v62 = vmul.f32 %v1810_v7, %v1927_v33  ;;  %v630_v1 = vadd.f32 %v614_v55, %v594_v18 }
  0xc0   : > { %v506_v63 = vadd.f32 %v490_v51, %v470_v53  ;;  %v873_v49 = vmul.f32 %v1804_v0, %v1993_v61  ;;  %v367_v2 = vrot.slane %v1980_v52, 7  ;;  %v920_v3 = vadd.f32 %v888_v60, %v697_v40 }
  0xc1   : > { %v853_v4 = vadd.f32 %v837_v62, %v817_v39  ;;  %v377_v5 = vrot.slane %v1989_v59, 7  ;;  %v435_v54 = vmul.f32 %v1754_v35, %v1886_v8  ;;  %v666_v9 = vadd.f32 %v650_v57, %v630_v1  ;;  %v2050_v39 = vld [vmem:[#allocation2 + $0x60] sm:$0xff]  ;;  %v2052_v62 = vld [vmem:[#allocation2 + $0x68] sm:$0xff] }
  0xc2   : > { %v455_v50 = vmul.f32 %v1756_v36, %v1948_v14  ;;  %v595_v10 = vmul.f32 %v1766_v43, %v1848_v31  ;;  %v615_v13 = vmul.f32 %v1770_v46, %v1915_v45  ;;  %v975_v56 = vadd.f32 %v1855_v44, %v920_v3 }
  0xc3   : > { %v889_v32 = vadd.f32 %v873_v49, %v853_v4  ;;  %v398_v15 = vsel %vm382_vm0, %v377_v5, %v367_v2  ;;  %v651_v17 = vmul.f32 %v1772_v47, %v1980_v52  ;;  %v698_v8 = vadd.f32 %v666_v9, %v506_v63 }
  0xc4   : > { %v2018_v38 = vsel %vm403_vm1, %v398_v15, 0.0  ;;  %v471_v20 = vadd.f32 %v455_v50, %v435_v54  ;;  %v631_v22 = vadd.f32 %v615_v13, %v595_v10  ;;  %991 = vst [vmem:[%s1714_s24 + $0x20] sm:$0xff] %v975_v56  ;;  %v750_v23 = vrot.slane %v1980_v52, 1 }
  0xc5   : > { %v491_v31 = vmul.f32 %v1758_v37, %v2018_v38  ;;  %v760_v24 = vrot.slane %v1989_v59, 1  ;;  %v818_v11 = vmul.f32 %v1808_v6, %v1902_v25  ;;  %v921_v26 = vadd.f32 %v889_v32, %v698_v8 }
  0xc6   : > { %v667_v28 = vadd.f32 %v651_v17, %v631_v22  ;;  %v838_v29 = vmul.f32 %v1810_v7, %v1970_v34  ;;  %v2031_v16 = vsel %vm382_vm0, %v367_v2, %v377_v5  ;;  %v436_v41 = vmul.f32 %v1754_v35, %v1897_v21 }
  0xc7   : > { %v507_v12 = vadd.f32 %v491_v31, %v471_v20  ;;  %v2035_v40 = vsel %vm765_vm2, %v750_v23, %v760_v24  ;;  %v456_v25 = vmul.f32 %v1756_v36, %v1963_v27  ;;  %v976_v51 = vadd.f32 %v1855_v44, %v921_v26 }
  0xc8   : > { %v854_v18 = vadd.f32 %v838_v29, %v818_v11  ;;  %v874_v53 = vmul.f32 %v1804_v0, %v2035_v40  ;;  %v492_v55 = vmul.f32 %v1758_v37, %v2031_v16  ;;  %v596_v60 = vmul.f32 %v1766_v43, %v1850_v42 }
  0xc9   : > { %v699_v57 = vadd.f32 %v667_v28, %v507_v12  ;;  %v472_v58 = vadd.f32 %v456_v25, %v436_v41  ;;  %v616_v21 = vmul.f32 %v1770_v46, %v1917_v48  ;;  %992 = vst [vmem:[%s1714_s24 + $0x28] sm:$0xff] %v976_v51  ;;  %v652_v1 = vmul.f32 %v1772_v47, %v1989_v59 }
  0xca   : > { %v890_v63 = vadd.f32 %v874_v53, %v854_v18  ;;  %v781_v49 = vsel %vm765_vm2, %v760_v24, %v750_v23  ;;  %v819_v2 = vmul.f32 %v1808_v6, %v1927_v33  ;;  %v839_v5 = vmul.f32 %v1810_v7, %v1993_v61 }
  0xcb   : > { %v508_v3 = vadd.f32 %v492_v55, %v472_v58  ;;  %v632_v42 = vadd.f32 %v616_v21, %v596_v60  ;;  %v2063_v4 = vsel %vm787_vm3, %v781_v49, 0.0  ;;  %v368_v50 = vrot.slane %v2050_v39, 7 }
  0xcc   : > { %v922_v54 = vadd.f32 %v890_v63, %v699_v57  ;;  %v875_v9 = vmul.f32 %v1804_v0, %v2063_v4  ;;  %v378_v10 = vrot.slane %v2052_v62, 7  ;;  %v855_v33 = vadd.f32 %v839_v5, %v819_v2  ;;  %v2125_v5 = vld [vmem:[#allocation2 + $0x78] sm:$0xff] }
  0xcd   : > { %v668_v13 = vadd.f32 %v652_v1, %v632_v42  ;;  %v437_v56 = vmul.f32 %v1754_v35, %v1948_v14  ;;  %v457_v32 = vmul.f32 %v1756_v36, %v2018_v38  ;;  %v597_v8 = vmul.f32 %v1766_v43, %v1915_v45  ;;  %v2116_v1 = vld [vmem:[#allocation2 + $0x70] sm:$0xff] }
  0xce   : > { %v977_v15 = vadd.f32 %v1855_v44, %v922_v54  ;;  %v399_v17 = vsel %vm382_vm0, %v378_v10, %v368_v50  ;;  %v617_v20 = vmul.f32 %v1770_v46, %v1980_v52  ;;  %v891_v31 = vadd.f32 %v875_v9, %v855_v33 }
  0xcf   : > { %v700_v22 = vadd.f32 %v668_v13, %v508_v3  ;;  %v2084_v23 = vsel %vm403_vm1, %v399_v17, 0.0  ;;  %v473_v14 = vadd.f32 %v457_v32, %v437_v56  ;;  %v653_v26 = vmul.f32 %v1772_v47, %v2050_v39 }
  0xd0   : > { %993 = vst [vmem:[%s1714_s24 + $0x30] sm:$0xff] %v977_v15  ;;  %v493_v24 = vmul.f32 %v1758_v37, %v2084_v23  ;;  %v633_v11 = vadd.f32 %v617_v20, %v597_v8  ;;  %v751_v45 = vrot.slane %v2050_v39, 1  ;;  %v761_v29 = vrot.slane %v2052_v62, 1 }
  0xd1   : > { %v923_v28 = vadd.f32 %v891_v31, %v700_v22  ;;  %v820_v12 = vmul.f32 %v1808_v6, %v1970_v34  ;;  %v840_v41 = vmul.f32 %v1810_v7, %v2035_v40  ;;  %v2099_v18 = vsel %vm382_vm0, %v368_v50, %v378_v10 }
  0xd2   : > { %v509_v25 = vadd.f32 %v493_v24, %v473_v14  ;;  %v669_v51 = vadd.f32 %v653_v26, %v633_v11  ;;  %v438_v53 = vmul.f32 %v1754_v35, %v1963_v27  ;;  %v2106_v57 = vsel %vm765_vm2, %v751_v45, %v761_v29 }
  0xd3   : > { %v978_v55 = vadd.f32 %v1855_v44, %v923_v28  ;;  %v856_v58 = vadd.f32 %v840_v41, %v820_v12  ;;  %v458_v34 = vmul.f32 %v1756_v36, %v2031_v16  ;;  %v876_v21 = vmul.f32 %v1804_v0, %v2106_v57 }
  0xd4   : > { %v701_v60 = vadd.f32 %v669_v51, %v509_v25  ;;  %v494_v63 = vmul.f32 %v1758_v37, %v2099_v18  ;;  %v598_v27 = vmul.f32 %v1766_v43, %v1917_v48  ;;  %v618_v2 = vmul.f32 %v1770_v46, %v1989_v59 }
  0xd5   : > { %994 = vst [vmem:[%s1714_s24 + $0x38] sm:$0xff] %v978_v55  ;;  %v474_v49 = vadd.f32 %v458_v34, %v438_v53  ;;  %v654_v3 = vmul.f32 %v1772_v47, %v2052_v62  ;;  %v782_v42 = vsel %vm765_vm2, %v761_v29, %v751_v45  ;;  %v892_v54 = vadd.f32 %v876_v21, %v856_v58 }
  0xd6   : > { %v2129_v9 = vsel %vm787_vm3, %v782_v42, 0.0  ;;  %v821_v48 = vmul.f32 %v1808_v6, %v1993_v61  ;;  %v841_v50 = vmul.f32 %v1810_v7, %v2063_v4  ;;  %v634_v13 = vadd.f32 %v618_v2, %v598_v27 }
  0xd7   : > { %v510_v10 = vadd.f32 %v494_v63, %v474_v49  ;;  %v877_v33 = vmul.f32 %v1804_v0, %v2129_v9  ;;  %v369_v56 = vrot.slane %v2116_v1, 7  ;;  %v924_v32 = vadd.f32 %v892_v54, %v701_v60 }
  0xd8   : > { %v857_v15 = vadd.f32 %v841_v50, %v821_v48  ;;  %v379_v17 = vrot.slane %v2125_v5, 7  ;;  %v439_v8 = vmul.f32 %v1754_v35, %v2018_v38  ;;  %v670_v20 = vadd.f32 %v654_v3, %v634_v13  ;;  %v2186_v48 = vld [vmem:[#allocation2 + $0x80] sm:$0xff]  ;;  %v2188_v50 = vld [vmem:[#allocation2 + $0x88] sm:$0xff] }
  0xd9   : > { %v459_v61 = vmul.f32 %v1756_v36, %v2084_v23  ;;  %v599_v22 = vmul.f32 %v1766_v43, %v1980_v52  ;;  %v619_v31 = vmul.f32 %v1770_v46, %v2050_v39  ;;  %v979_v14 = vadd.f32 %v1855_v44, %v924_v32 }
  0xda   : > { %v893_v24 = vadd.f32 %v877_v33, %v857_v15  ;;  %v400_v11 = vsel %vm382_vm0, %v379_v17, %v369_v56  ;;  %v655_v26 = vmul.f32 %v1772_v47, %v2116_v1  ;;  %v702_v38 = vadd.f32 %v670_v20, %v510_v10 }
  0xdb   : > { %v2154_v45 = vsel %vm403_vm1, %v400_v11, 0.0  ;;  %v475_v28 = vadd.f32 %v459_v61, %v439_v8  ;;  %v635_v29 = vadd.f32 %v619_v31, %v599_v22  ;;  %995 = vst [vmem:[%s1714_s24 + $0x40] sm:$0xff] %v979_v14  ;;  %v752_v12 = vrot.slane %v2116_v1, 1 }
  0xdc   : > { %v495_v52 = vmul.f32 %v1758_v37, %v2154_v45  ;;  %v762_v41 = vrot.slane %v2125_v5, 1  ;;  %v822_v25 = vmul.f32 %v1808_v6, %v2035_v40  ;;  %v925_v51 = vadd.f32 %v893_v24, %v702_v38 }
  0xdd   : > { %v671_v53 = vadd.f32 %v655_v26, %v635_v29  ;;  %v842_v55 = vmul.f32 %v1810_v7, %v2106_v57  ;;  %v2167_v58 = vsel %vm382_vm0, %v369_v56, %v379_v17  ;;  %v440_v21 = vmul.f32 %v1754_v35, %v2031_v16 }
  0xde   : > { %v511_v34 = vadd.f32 %v495_v52, %v475_v28  ;;  %v2171_v60 = vsel %vm765_vm2, %v752_v12, %v762_v41  ;;  %v460_v40 = vmul.f32 %v1756_v36, %v2099_v18  ;;  %v980_v63 = vadd.f32 %v1855_v44, %v925_v51 }
  0xdf   : > { %v858_v27 = vadd.f32 %v842_v55, %v822_v25  ;;  %v878_v49 = vmul.f32 %v1804_v0, %v2171_v60  ;;  %v496_v2 = vmul.f32 %v1758_v37, %v2167_v58  ;;  %v600_v54 = vmul.f32 %v1766_v43, %v1989_v59 }
  0xe0   : > { %v703_v3 = vadd.f32 %v671_v53, %v511_v34  ;;  %v476_v42 = vadd.f32 %v460_v40, %v440_v21  ;;  %v620_v16 = vmul.f32 %v1770_v46, %v2052_v62  ;;  %996 = vst [vmem:[%s1714_s24 + $0x48] sm:$0xff] %v980_v63  ;;  %v656_v13 = vmul.f32 %v1772_v47, %v2125_v5 }
  0xe1   : > { %v894_v10 = vadd.f32 %v878_v49, %v858_v27  ;;  %v783_v33 = vsel %vm765_vm2, %v762_v41, %v752_v12  ;;  %v823_v56 = vmul.f32 %v1808_v6, %v2063_v4  ;;  %v843_v17 = vmul.f32 %v1810_v7, %v2129_v9 }
  0xe2   : > { %v512_v32 = vadd.f32 %v496_v2, %v476_v42  ;;  %v636_v59 = vadd.f32 %v620_v16, %v600_v54  ;;  %v2199_v15 = vsel %vm787_vm3, %v783_v33, 0.0  ;;  %v370_v61 = vrot.slane %v2186_v48, 7  ;;  %v360_v33 = vld [vmem:[#allocation2 + $0x90] sm:$0xff] }
  0xe3   : > { %v926_v8 = vadd.f32 %v894_v10, %v703_v3  ;;  %v879_v20 = vmul.f32 %v1804_v0, %v2199_v15  ;;  %v380_v22 = vrot.slane %v2188_v50, 7  ;;  %v859_v4 = vadd.f32 %v843_v17, %v823_v56  ;;  %v361_v17 = vld [vmem:[#allocation2 + $0x98] sm:$0xff] }
  0xe4   : > { %v672_v31 = vadd.f32 %v656_v13, %v636_v59  ;;  %v441_v14 = vmul.f32 %v1754_v35, %v2084_v23  ;;  %v461_v24 = vmul.f32 %v1756_v36, %v2154_v45  ;;  %v601_v38 = vmul.f32 %v1766_v43, %v2050_v39 }
  0xe5   : > { %v981_v11 = vadd.f32 %v1855_v44, %v926_v8  ;;  %v401_v26 = vsel %vm382_vm0, %v380_v22, %v370_v61  ;;  %v621_v28 = vmul.f32 %v1770_v46, %v2116_v1  ;;  %v895_v52 = vadd.f32 %v879_v20, %v859_v4 }
  0xe6   : > { %v704_v29 = vadd.f32 %v672_v31, %v512_v32  ;;  %v421_v12 = vsel %vm403_vm1, %v401_v26, 0.0  ;;  %v477_v23 = vadd.f32 %v461_v24, %v441_v14  ;;  %v657_v51 = vmul.f32 %v1772_v47, %v2186_v48 }
  0xe7   : > { %997 = vst [vmem:[%s1714_s24 + $0x50] sm:$0xff] %v981_v11  ;;  %v497_v41 = vmul.f32 %v1758_v37, %v421_v12  ;;  %v637_v25 = vadd.f32 %v621_v28, %v601_v38  ;;  %v753_v53 = vrot.slane %v2186_v48, 1  ;;  %v763_v39 = vrot.slane %v2188_v50, 1 }
  0xe8   : > { %v927_v55 = vadd.f32 %v895_v52, %v704_v29  ;;  %v824_v34 = vmul.f32 %v1808_v6, %v2106_v57  ;;  %v844_v21 = vmul.f32 %v1810_v7, %v2171_v60  ;;  %v391_v27 = vsel %vm382_vm0, %v370_v61, %v380_v22 }
  0xe9   : > { %v513_v40 = vadd.f32 %v497_v41, %v477_v23  ;;  %v673_v63 = vadd.f32 %v657_v51, %v637_v25  ;;  %v442_v49 = vmul.f32 %v1754_v35, %v2099_v18  ;;  %v774_v3 = vsel %vm765_vm2, %v753_v53, %v763_v39 }
  0xea   : > { %v982_v2 = vadd.f32 %v1855_v44, %v927_v55  ;;  %v860_v42 = vadd.f32 %v844_v21, %v824_v34  ;;  %v462_v57 = vmul.f32 %v1756_v36, %v2167_v58  ;;  %v880_v16 = vmul.f32 %v1804_v0, %v774_v3 }
  0xeb   : > { %v705_v54 = vadd.f32 %v673_v63, %v513_v40  ;;  %v498_v10 = vmul.f32 %v1758_v37, %v391_v27  ;;  %v602_v13 = vmul.f32 %v1766_v43, %v2052_v62  ;;  %v622_v56 = vmul.f32 %v1770_v46, %v2125_v5 }
  0xec   : > { %998 = vst [vmem:[%s1714_s24 + $0x58] sm:$0xff] %v982_v2  ;;  %v478_v18 = vadd.f32 %v462_v57, %v442_v49  ;;  %v658_v32 = vmul.f32 %v1772_v47, %v2188_v50  ;;  %v784_v59 = vsel %vm765_vm2, %v763_v39, %v753_v53  ;;  %v896_v8 = vadd.f32 %v880_v16, %v860_v42 }
  0xed   : > { %v805_v20 = vsel %vm787_vm3, %v784_v59, 0.0  ;;  %v825_v62 = vmul.f32 %v1808_v6, %v2129_v9  ;;  %v845_v61 = vmul.f32 %v1810_v7, %v2199_v15  ;;  %v638_v31 = vadd.f32 %v622_v56, %v602_v13 }
  0xee   : > { %v514_v22 = vadd.f32 %v498_v10, %v478_v18  ;;  %v881_v4 = vmul.f32 %v1804_v0, %v805_v20  ;;  %v371_v14 = vrot.slane %v360_v33, 7  ;;  %v928_v24 = vadd.f32 %v896_v8, %v705_v54 }
  0xef   : > { %v861_v11 = vadd.f32 %v845_v61, %v825_v62  ;;  %v381_v26 = vrot.slane %v361_v17, 7  ;;  %v443_v38 = vmul.f32 %v1754_v35, %v2154_v45  ;;  %v674_v28 = vadd.f32 %v658_v32, %v638_v31 }
  0xf0   : > { %v463_v29 = vmul.f32 %v1756_v36, %v421_v12  ;;  %v603_v9 = vmul.f32 %v1766_v43, %v2116_v1  ;;  %v623_v52 = vmul.f32 %v1770_v46, %v2186_v48  ;;  %v983_v23 = vadd.f32 %v1855_v44, %v928_v24 }
  0xf1   : > { %v897_v41 = vadd.f32 %v881_v4, %v861_v11  ;;  %v402_v25 = vsel %vm382_vm0, %v381_v26, %v371_v14  ;;  %v659_v51 = vmul.f32 %v1772_v47, %v360_v33  ;;  %v706_v53 = vadd.f32 %v674_v28, %v514_v22 }
  0xf2   : > { %v423_v45 = vsel %vm403_vm1, %v402_v25, 0.0  ;;  %v479_v55 = vadd.f32 %v463_v29, %v443_v38  ;;  %v639_v12 = vadd.f32 %v623_v52, %v603_v9  ;;  %999 = vst [vmem:[%s1714_s24 + $0x60] sm:$0xff] %v983_v23  ;;  %v754_v39 = vrot.slane %v360_v33, 1 }
  0xf3   : > { %v499_v1 = vmul.f32 %v1758_v37, %v423_v45  ;;  %v764_v34 = vrot.slane %v361_v17, 1  ;;  %v826_v48 = vmul.f32 %v1808_v6, %v2171_v60  ;;  %v929_v21 = vadd.f32 %v897_v41, %v706_v53 }
  0xf4   : > { %v675_v40 = vadd.f32 %v659_v51, %v639_v12  ;;  %v846_v63 = vmul.f32 %v1810_v7, %v774_v3  ;;  %v392_v49 = vsel %vm382_vm0, %v371_v14, %v381_v26  ;;  %v444_v57 = vmul.f32 %v1754_v35, %v2167_v58 }
  0xf5   : > { %v515_v2 = vadd.f32 %v499_v1, %v479_v55  ;;  %v775_v42 = vsel %vm765_vm2, %v754_v39, %v764_v34  ;;  %v464_v54 = vmul.f32 %v1756_v36, %v391_v27  ;;  %v984_v60 = vadd.f32 %v1855_v44, %v929_v21 }
  0xf6   : > { %v862_v16 = vadd.f32 %v846_v63, %v826_v48  ;;  %v882_v10 = vmul.f32 %v1804_v0, %v775_v42  ;;  %v500_v3 = vmul.f32 %v1758_v37, %v392_v49  ;;  %v604_v18 = vmul.f32 %v1766_v43, %v2125_v5 }
  0xf7   : > { %v707_v13 = vadd.f32 %v675_v40, %v515_v2  ;;  %v480_v33 = vadd.f32 %v464_v54, %v444_v57  ;;  %v624_v56 = vmul.f32 %v1770_v46, %v2188_v50  ;;  %1000 = vst [vmem:[%s1714_s24 + $0x68] sm:$0xff] %v984_v60  ;;  %v660_v58 = vmul.f32 %v1772_v47, %v361_v17 }
  0xf8   : > { %v898_v35 = vadd.f32 %v882_v10, %v862_v16  ;;  %v785_v36 = vsel %vm765_vm2, %v764_v34, %v754_v39  ;;  %v827_v27 = vmul.f32 %v1808_v6, %v2199_v15  ;;  %v847_v46 = vmul.f32 %v1810_v7, %v805_v20 }
  0xf9   : > { %v516_v37 = vadd.f32 %v500_v3, %v480_v33  ;;  %v640_v32 = vadd.f32 %v624_v56, %v604_v18  ;;  %v807_v43 = vsel %vm787_vm3, %v785_v36, 0.0 }
  0xfa   : > { %v930_v5 = vadd.f32 %v898_v35, %v707_v13  ;;  %v883_v19 = vmul.f32 %v1804_v0, %v807_v43  ;;  %v863_v50 = vadd.f32 %v847_v46, %v827_v27 }
  0xfb   : > { %v676_v47 = vadd.f32 %v660_v58, %v640_v32 }
  0xfc   : > { %v985_v6 = vadd.f32 %v1855_v44, %v930_v5  ;;  %v899_v59 = vadd.f32 %v883_v19, %v863_v50 }
  0xfd   : > { %v708_v15 = vadd.f32 %v676_v47, %v516_v37 }
  0xfe   : > { %1001 = vst [vmem:[%s1714_s24 + $0x70] sm:$0xff] %v985_v6 }
  0xff   : > { %v931_v30 = vadd.f32 %v899_v59, %v708_v15 }
 0x101   : > { %v986_v7 = vadd.f32 %v1855_v44, %v931_v30 }
 0x103   : > { %1002 = vst [vmem:[%s1714_s24 + $0x78] sm:$0xff] %v986_v7 }
 0x104   : > { %1369 = shalt.err (!%p1366_p1)
}
 0x105   : > { %s1370_s24 = scalar_lea.hbm %s2310_s0, 2048  ;;  %s1374_s9 = scalar_lea.hbm %s2369_s4, 8192 }
 0x106   : > { %p1371_p3 = scmp.ne.s32.totalorder %s2310_s0, %s1370_s24  ;;  %p1375_p0 = scmp.lt.u32.totalorder %s2310_s0, %s2369_s4 }
 0x107   : > { %p1376_p6 = scmp.lt.u32.totalorder %s1374_s9, %s1370_s24  ;;  %p1378_p13 = scmp.lt.u32.totalorder %s1370_s24, %s2310_s0 }
 0x108   : > { %p1372_p5 = pnand %p1371_p3, %p2390_p4 }
 0x109   : > { %p1377_p7 = por %p1376_p6, %p1375_p0 }
 0x10a   : > { %p1373_p2 = pneg %p1372_p5 }
 0x10b   : > { %p1379_p10 = por %p1378_p13, %p1377_p7 }
 0x10d   : > { %p1380_p9 = pnand %p1379_p10, %p1373_p2 }
 0x10f   : > { %1383 = shalt.err (!%p1380_p9)
}
 0x110   : > { %s1472_s23 = smov 128   ;;  %s1473_s7 = smov 8  }
 0x111   : > { %1182 = dma.vmem_to_hbm [thread:$0]  (%p2390_p4), %s2304_s18, 2048, %s2310_s0, %s1004_s12, %s1472_s23, %s1472_s23, %s1473_s7  }
 0x112 PF: > { %p1197_p12 = scmp.ge.s32.totalorder %s1462_s22, 2  ;;  %s1035_s19 = sand.u32 1, %s1434_s15  }
 0x113   : > { %p2391_p8 = scmp.ne.s32.totalorder %s2383_s8, 0  ;;  %s1036_s14 = scalar_lea.sflag [#allocation7], %s1035_s19 }
 0x115   : > { %p1189_p11 = pnand %p1197_p12, %p2391_p8 }
 0x117   : > { %1429 = dma.done.wait (!%p1189_p11), %s1036_s14, 2048  }
 0x118   : > { %1431 = vsyncadd (!%p1189_p11), %s1036_s14, 4294965248  ;;  %s20_s22 = sadd.s32 1, %s1462_s22   ;;  %s2392_s19 = sld [smem:[#allocation19_spill]] }
 0x119   : > { %p17_p1 = scmp.ge.s32.totalorder %s20_s22, 6   ;;  %s2393_s5 = sld [smem:[#allocation20_spill]] }
 0x11a   : > { %s2394_s21 = sld [smem:[#allocation21_spill]]  ;;  %s2395_s15 = smov %s1438_s16 }
 0x11b   : > { %s2396_s16 = smov %s1442_s17  ;;  %s2397_s17 = smov %s1577_s10 }
 0x11c   : > { %s2398_s18 = smov %s1454_s20  ;;  %19 = sbr.rel (!%p17_p1) target bundleno = 9 (0x9), region = 117 }
 0x11f   : > { %s2399_s20 = smov %s2393_s5 }
 0x123   :  { %1041 = vsyncpa [#allocation6], 1 }
 0x124   :  { %1043 = vsyncpa [#allocation6 + $0x1], 1 }
 0x125   :  { %1044 = vsyncpa [#allocation7], 1 }
 0x126   :  { %1046 = vsyncpa [#allocation7 + $0x1], 1 }
 0x127   :  { %1047 = vsyncmov [#allocation4] }
 0x12a   :  { %s1048_s8 = vpop.sfrf %1047 }
 0x12b   :  { %p1168_p4 = scmp.ne.s32.totalorder %s1048_s8, 0 }
 0x12d   :  { %1052 = shalt.err (%p1168_p4)  }
 0x12e   :  { %1054 = vsyncmov [#allocation4 + $0x1] }
 0x131   :  { %s1055_s10 = vpop.sfrf %1054 }
 0x132   :  { %p1169_p3 = scmp.ne.s32.totalorder %s1055_s10, 0 }
 0x134   :  { %1059 = shalt.err (%p1169_p3)  }

</bundles_post_ra>
